<compile_context>
chip_gen: v5e
topology: v5e:2x2
jax: 0.10.0
libtpu: 0.0.40
codegen_flags: <defaults>
</compile_context>

<pallas_src>
import math
import functools

import jax
import jax.numpy as jnp
from jax import lax
from jax.experimental import pallas as pl
from jax.experimental.pallas import tpu as pltpu

NEG_INF = jnp.float32(-1e9)   # finite "masked" value (safe in f32 softmax)
LN_EPS = 1e-5                 # PyTorch LayerNorm / TransformerDecoderLayer default


# ----------------------------------------------------------------------------- kernels

def _layernorm(y, g, b, eps):
    mu = jnp.mean(y, axis=-1, keepdims=True)
    var = jnp.mean((y - mu) ** 2, axis=-1, keepdims=True)
    return ((y - mu) * lax.rsqrt(var + eps)) * g + b


def _mha_ln_kernel(x_ref, kv_ref, mask_ref,
                   wq_ref, bq_ref, wkv_ref, bkv_ref, wo_ref, bo_ref,
                   g_ref, bln_ref, o_ref, *, nhead, scale, eps):
    """Fused per-batch-element block: LayerNorm(x + MultiheadAttention(x, kv, kv))."""
    x = x_ref[0]        # (Lq, D) f32
    kv = kv_ref[0]      # (Lk, D) f32
    m = mask_ref[0]     # (Mq, Lk) f32 additive mask, Mq in {Lq, 1}; broadcasts below
    Lq, D = x.shape
    Dh = D // nhead

    xb = x.astype(jnp.bfloat16)
    kvb = kv.astype(jnp.bfloat16)

    # Q projection and fused K/V projection (single (D, 2D) matmul), bf16 in / f32 acc.
    q = jnp.dot(xb, wq_ref[...], preferred_element_type=jnp.float32) + bq_ref[...]       # (Lq, D)
    kvp = jnp.dot(kvb, wkv_ref[...], preferred_element_type=jnp.float32) + bkv_ref[...]  # (Lk, 2D)
    k = kvp[:, :D]
    v = kvp[:, D:]

    # Per-head attention, unrolled (nhead is small & static). The output projection is
    # accumulated per head: sum_h (softmax(q_h k_h^T) v_h) @ W_o[h*Dh:(h+1)*Dh, :]
    # -> no concat, no JAX-level transposes, attention output lands directly in (Lq, D).
    attn = jnp.zeros((Lq, D), jnp.float32)
    for h in range(nhead):
        sl = slice(h * Dh, (h + 1) * Dh)
        qh = q[:, sl].astype(jnp.bfloat16)   # (Lq, Dh)
        kh = k[:, sl].astype(jnp.bfloat16)   # (Lk, Dh)
        vh = v[:, sl].astype(jnp.bfloat16)   # (Lk, Dh)

        # contract on Dh of both operands (no explicit k.T)
        s = lax.dot_general(qh, kh, (((1,), (1,)), ((), ())),
                            preferred_element_type=jnp.float32) * scale + m   # (Lq, Lk)
        s = s - jnp.max(s, axis=-1, keepdims=True)
        p = jnp.exp(s)
        p = p * pl.reciprocal(jnp.sum(p, axis=-1, keepdims=True), approx=True)

        oh = jnp.dot(p.astype(jnp.bfloat16), vh, preferred_element_type=jnp.float32)      # (Lq, Dh)
        attn = attn + jnp.dot(oh.astype(jnp.bfloat16), wo_ref[sl, :],
                              preferred_element_type=jnp.float32)

    # residual + post-LayerNorm (nn.TransformerDecoderLayer default norm_first=False)
    y = x + attn + bo_ref[...]
    o_ref[0] = _layernorm(y, g_ref[...], bln_ref[...], eps)


def _ffn_ln_kernel(x_ref, w1_ref, b1_ref, w2_ref, b2_ref, g_ref, bln_ref, o_ref, *, eps):
    """Fused feed-forward block: LayerNorm(x + W2(relu(W1 x + b1)) + b2)."""
    x = x_ref[...]                                                               # (TM, D) f32
    h = jnp.dot(x.astype(jnp.bfloat16), w1_ref[...].astype(jnp.bfloat16),
                preferred_element_type=jnp.float32) + b1_ref[...]
    h = jnp.maximum(h, 0.0)
    y = jnp.dot(h.astype(jnp.bfloat16), w2_ref[...].astype(jnp.bfloat16),
                preferred_element_type=jnp.float32) + b2_ref[...]
    o_ref[...] = _layernorm(x + y, g_ref[...], bln_ref[...], eps)


def _proj_relu_ln_kernel(x_ref, w_ref, b_ref, g_ref, bln_ref, o_ref, *, eps):
    """attn_proj: Linear -> ReLU -> Dropout(identity) -> LayerNorm, fused."""
    h = jnp.dot(x_ref[...].astype(jnp.bfloat16), w_ref[...].astype(jnp.bfloat16),
                preferred_element_type=jnp.float32) + b_ref[...]
    h = jnp.maximum(h, 0.0)
    o_ref[...] = _layernorm(h, g_ref[...], bln_ref[...], eps)


def _linear_kernel(x_ref, w_ref, b_ref, o_ref, acc_ref, *, activation):
    """Tiled linear (P1 + P3): M/N parallel, K reduction with f32 VMEM accumulator."""
    @pl.when(pl.program_id(2) == 0)
    def _():
        acc_ref[...] = jnp.zeros_like(acc_ref)

    acc_ref[...] += jnp.dot(x_ref[...].astype(jnp.bfloat16),
                            w_ref[...].astype(jnp.bfloat16),
                            preferred_element_type=jnp.float32)

    @pl.when(pl.program_id(2) == pl.num_programs(2) - 1)
    def _():
        y = acc_ref[...] + b_ref[...]
        if activation == "relu":
            y = jnp.maximum(y, 0.0)
        o_ref[...] = y.astype(o_ref.dtype)


# ----------------------------------------------------------------------------- wrappers

def _row_tile(m):
    return m if m <= 256 else 256


def mha_ln_block(x, kv, mask, p, nhead, eps=LN_EPS):
    """x: (B, Lq, D), kv: (B, Lk, D), mask: (B, Mq, Lk) additive (Mq in {Lq, 1})."""
    B, Lq, D = x.shape
    Lk = kv.shape[1]
    Mq = mask.shape[1]
    Dh = D // nhead
    kernel = functools.partial(_mha_ln_kernel, nhead=nhead,
                               scale=1.0 / math.sqrt(Dh), eps=eps)
    return pl.pallas_call(
        kernel,
        out_shape=jax.ShapeDtypeStruct((B, Lq, D), jnp.float32),
        grid=(B,),
        in_specs=[
            pl.BlockSpec((1, Lq, D), lambda b: (b, 0, 0)),     # x (also the residual)
            pl.BlockSpec((1, Lk, D), lambda b: (b, 0, 0)),     # kv
            pl.BlockSpec((1, Mq, Lk), lambda b: (b, 0, 0)),    # compact mask (no H repeat)
            pl.BlockSpec((D, D), lambda b: (0, 0)),            # wq   (bf16)
            pl.BlockSpec((1, D), lambda b: (0, 0)),            # bq
            pl.BlockSpec((D, 2 * D), lambda b: (0, 0)),        # wkv  (bf16, fused K|V)
            pl.BlockSpec((1, 2 * D), lambda b: (0, 0)),        # bkv
            pl.BlockSpec((D, D), lambda b: (0, 0)),            # wo   (bf16)
            pl.BlockSpec((1, D), lambda b: (0, 0)),            # bo
            pl.BlockSpec((1, D), lambda b: (0, 0)),            # ln gamma
            pl.BlockSpec((1, D), lambda b: (0, 0)),            # ln beta
        ],
        out_specs=pl.BlockSpec((1, Lq, D), lambda b: (b, 0, 0)),
        compiler_params=pltpu.CompilerParams(dimension_semantics=("parallel",)),
    )(x, kv, mask, p["wq"], p["bq"], p["wkv"], p["bkv"], p["wo"], p["bo"],
      p["ln_g"], p["ln_b"])


def ffn_ln_block(x2d, p, eps=LN_EPS):
    M, D = x2d.shape
    FF = p["w1"].shape[1]
    TM = _row_tile(M)
    kernel = functools.partial(_ffn_ln_kernel, eps=eps)
    return pl.pallas_call(
        kernel,
        out_shape=jax.ShapeDtypeStruct((M, D), jnp.float32),
        grid=(pl.cdiv(M, TM),),
        in_specs=[
            pl.BlockSpec((TM, D), lambda i: (i, 0)),
            pl.BlockSpec((D, FF), lambda i: (0, 0)),
            pl.BlockSpec((1, FF), lambda i: (0, 0)),
            pl.BlockSpec((FF, D), lambda i: (0, 0)),
            pl.BlockSpec((1, D), lambda i: (0, 0)),
            pl.BlockSpec((1, D), lambda i: (0, 0)),
            pl.BlockSpec((1, D), lambda i: (0, 0)),
        ],
        out_specs=pl.BlockSpec((TM, D), lambda i: (i, 0)),
        compiler_params=pltpu.CompilerParams(dimension_semantics=("parallel",)),
    )(x2d, p["w1"], p["b1"], p["w2"], p["b2"], p["ln_g"], p["ln_b"])


def proj_relu_layernorm(x2d, w, b, g, bln, eps=LN_EPS):
    M, K = x2d.shape
    N = w.shape[1]
    TM = _row_tile(M)
    kernel = functools.partial(_proj_relu_ln_kernel, eps=eps)
    return pl.pallas_call(
        kernel,
        out_shape=jax.ShapeDtypeStruct((M, N), jnp.float32),
        grid=(pl.cdiv(M, TM),),
        in_specs=[
            pl.BlockSpec((TM, K), lambda i: (i, 0)),
            pl.BlockSpec((K, N), lambda i: (0, 0)),
            pl.BlockSpec((1, N), lambda i: (0, 0)),
            pl.BlockSpec((1, N), lambda i: (0, 0)),
            pl.BlockSpec((1, N), lambda i: (0, 0)),
        ],
        out_specs=pl.BlockSpec((TM, N), lambda i: (i, 0)),
        compiler_params=pltpu.CompilerParams(dimension_semantics=("parallel",)),
    )(x2d, w, b, g, bln)


def pallas_linear(x2d, w, b=None, activation=None):
    """Tiled matmul: M/N parallel tiles, K as trailing 'arbitrary' reduction axis."""
    M, K = x2d.shape
    N = w.shape[1]
    if b is None:
        b = jnp.zeros((1, N), jnp.float32)
    TM = _row_tile(M)
    TN = N if N <= 256 else 256
    TK = 512 if (K > 512 and K % 512 == 0) else K   # tile K only when it divides exactly
    kernel = functools.partial(_linear_kernel, activation=activation)
    return pl.pallas_call(
        kernel,
        out_shape=jax.ShapeDtypeStruct((M, N), jnp.float32),
        grid=(pl.cdiv(M, TM), pl.cdiv(N, TN), K // TK),
        in_specs=[
            pl.BlockSpec((TM, TK), lambda i, j, k: (i, k)),
            pl.BlockSpec((TK, TN), lambda i, j, k: (k, j)),
            pl.BlockSpec((1, TN), lambda i, j, k: (0, j)),
        ],
        out_specs=pl.BlockSpec((TM, TN), lambda i, j, k: (i, j)),
        scratch_shapes=[pltpu.VMEM((TM, TN), jnp.float32)],
        compiler_params=pltpu.CompilerParams(
            dimension_semantics=("parallel", "parallel", "arbitrary")),
    )(x2d, w, b)


# ----------------------------------------------------------------------------- model

def make_positional_encoding(d_model, max_len=100):
    position = jnp.arange(max_len, dtype=jnp.float32)[:, None]
    div_term = jnp.exp(jnp.arange(0, d_model, 2, dtype=jnp.float32)
                       * (-math.log(10000.0) / d_model))
    pe = jnp.zeros((max_len, d_model), jnp.float32)
    pe = pe.at[:, 0::2].set(jnp.sin(position * div_term))
    pe = pe.at[:, 1::2].set(jnp.cos(position * div_term))
    return pe  # (max_len, d_model)


def xavier_uniform(key, shape):
    fan_in, fan_out = shape[0], shape[1]
    a = math.sqrt(6.0 / (fan_in + fan_out))
    return jax.random.uniform(key, shape, jnp.float32, -a, a)


def init_params(key, cfg):
    D, V, Da, FF, NL = (cfg["d_model"], cfg["vocab_size"], cfg["attn_emb_dim"],
                        cfg["dim_feedforward"], cfg["nlayers"])
    keys = iter(jax.random.split(key, 128))

    def xav(shape):
        return xavier_uniform(next(keys), shape)

    bf16 = jnp.bfloat16  # matmul weights stored in compute dtype once (no per-call astype)

    params = {
        "word_embedding": xav((V, D)),              # f32, gather only
        "pe": make_positional_encoding(D),
        "attn_proj": {
            "w": xav((Da, D)).astype(bf16),
            "b": jnp.zeros((1, D), jnp.float32),
            "ln_g": jnp.ones((1, D), jnp.float32),
            "ln_b": jnp.zeros((1, D), jnp.float32),
        },
        "classifier_w": xav((D, V)).astype(bf16),   # nn.Linear(..., bias=False)
        "layers": [],
    }

    def mha():
        return {
            "wq": xav((D, D)).astype(bf16),
            "bq": jnp.zeros((1, D), jnp.float32),
            "wkv": jnp.concatenate([xav((D, D)), xav((D, D))], axis=1).astype(bf16),
            "bkv": jnp.zeros((1, 2 * D), jnp.float32),
            "wo": xav((D, D)).astype(bf16),
            "bo": jnp.zeros((1, D), jnp.float32),
            "ln_g": jnp.ones((1, D), jnp.float32),
            "ln_b": jnp.zeros((1, D), jnp.float32),
        }

    for _ in range(NL):
        params["layers"].append({
            "self_attn": mha(),
            "cross_attn": mha(),
            "ffn": {
                "w1": xav((D, FF)).astype(bf16),
                "b1": jnp.zeros((1, FF), jnp.float32),
                "w2": xav((FF, D)).astype(bf16),
                "b2": jnp.zeros((1, D), jnp.float32),
                "ln_g": jnp.ones((1, D), jnp.float32),
                "ln_b": jnp.zeros((1, D), jnp.float32),
            },
        })
    return params


def transformer_decoder_forward(params, cfg, word, attn_emb, attn_emb_len, cap_padding_mask):
    D, H = cfg["d_model"], cfg["nhead"]
    B, L = word.shape
    Tm = attn_emb.shape[1]

    # ---- attn_proj: Linear -> ReLU -> Dropout(identity) -> LayerNorm (one fused kernel) ----
    ap = params["attn_proj"]
    mem = proj_relu_layernorm(attn_emb.reshape(B * Tm, -1), ap["w"], ap["b"],
                              ap["ln_g"], ap["ln_b"]).reshape(B, Tm, D)

    # ---- word embedding * sqrt(d_model) + positional encoding (glue in plain JAX) ----
    x = params["word_embedding"][word] * math.sqrt(D) + params["pe"][:L][None, :, :]

    # ---- compact additive masks: NO per-head replication, NO Lq broadcast for memory ----
    causal = jnp.where(jnp.arange(L)[None, :] > jnp.arange(L)[:, None], NEG_INF, 0.0)
    tgt_mask = causal[None, :, :] + jnp.where(cap_padding_mask[:, None, :], NEG_INF, 0.0)  # (B,L,L)
    mem_mask = jnp.where((jnp.arange(Tm)[None, :] >= attn_emb_len[:, None])[:, None, :],
                         NEG_INF, 0.0)                                                     # (B,1,Tm)

    # ---- nn.TransformerDecoderLayer (post-norm) x nlayers : 3 pallas_calls per layer ----
    for layer in params["layers"]:
        x = mha_ln_block(x, x, tgt_mask, layer["self_attn"], H)     # norm1(x + self_attn)
        x = mha_ln_block(x, mem, mem_mask, layer["cross_attn"], H)  # norm2(x + cross_attn)
        x = ffn_ln_block(x.reshape(B * L, D), layer["ffn"]).reshape(B, L, D)  # norm3(x + ff)

    logit = pallas_linear(x.reshape(B * L, D), params["classifier_w"]).reshape(B, L, -1)
    return {"embed": x, "logit": logit}


# ----------------------------------------------------------------------------- main

if __name__ == "__main__":
    cfg = dict(
        emb_dim=32, d_model=32, vocab_size=50, fc_emb_dim=64, attn_emb_dim=48,
        nhead=4, nlayers=2, dim_feedforward=128,
    )
    # TODO(synk): with d_model=32 / Dh=8, every last dim is < 128 lanes, so vreg/store
    # utilization is inherently low; real configs (d_model >= 128) are lane-dense as-is.
    B, L, Tm = 2, 8, 10

    root = jax.random.PRNGKey(0)
    k_param, k_word, k_attn = jax.random.split(root, 3)

    params = init_params(k_param, cfg)

    word = jax.random.randint(k_word, (B, L), 0, cfg["vocab_size"], dtype=jnp.int32)
    attn_emb = jax.random.normal(k_attn, (B, Tm, cfg["attn_emb_dim"]), jnp.float32)
    attn_emb_len = jnp.array([10, 7], dtype=jnp.int32)
    cap_lens = jnp.array([8, 6], dtype=jnp.int32)
    cap_padding_mask = jnp.arange(L)[None, :] >= cap_lens[:, None]   # True = padded

    @jax.jit
    def run(params, word, attn_emb, attn_emb_len, cap_padding_mask):
        return transformer_decoder_forward(params, cfg, word, attn_emb,
                                           attn_emb_len, cap_padding_mask)

    out = run(params, word, attn_emb, attn_emb_len, cap_padding_mask)
    jax.block_until_ready(out)

    assert out["embed"].shape == (B, L, cfg["d_model"])
    assert out["logit"].shape == (B, L, cfg["vocab_size"])
    assert bool(jnp.all(jnp.isfinite(out["logit"])))
    print("KERNEL_OK")
</pallas_src>

<mosaic_0001>
module attributes {stable_mosaic.version = 11 : i64} {
  func.func @_mha_ln_kernel(%arg0: i32, %arg1: memref<1x8x32xf32, #tpu.memory_space<vmem>>, %arg2: memref<1x8x32xf32, #tpu.memory_space<vmem>>, %arg3: memref<1x8x8xf32, #tpu.memory_space<vmem>>, %arg4: memref<32x32xbf16, #tpu.memory_space<vmem>>, %arg5: memref<1x32xf32, #tpu.memory_space<vmem>>, %arg6: memref<32x64xbf16, #tpu.memory_space<vmem>>, %arg7: memref<1x64xf32, #tpu.memory_space<vmem>>, %arg8: memref<32x32xbf16, #tpu.memory_space<vmem>>, %arg9: memref<1x32xf32, #tpu.memory_space<vmem>>, %arg10: memref<1x32xf32, #tpu.memory_space<vmem>>, %arg11: memref<1x32xf32, #tpu.memory_space<vmem>>, %arg12: memref<1x8x32xf32, #tpu.memory_space<vmem>>) attributes {dimension_semantics = [#tpu.dimension_semantics<parallel>], iteration_bounds = array<i64: 2>, scalar_prefetch = 0 : i64, scratch_operands = 0 : i64, tpu.core_type = #tpu.core_type<tc>, window_params = [{transform_indices = @transform_0, window_bounds = array<i64: 1, 8, 32>}, {transform_indices = @transform_1, window_bounds = array<i64: 1, 8, 32>}, {transform_indices = @transform_2, window_bounds = array<i64: 1, 8, 8>}, {pipeline_mode = #tpu.pipeline_mode<synchronous>, transform_indices = @transform_3, window_bounds = array<i64: 32, 32>}, {pipeline_mode = #tpu.pipeline_mode<synchronous>, transform_indices = @transform_4, window_bounds = array<i64: 1, 32>}, {pipeline_mode = #tpu.pipeline_mode<synchronous>, transform_indices = @transform_5, window_bounds = array<i64: 32, 64>}, {pipeline_mode = #tpu.pipeline_mode<synchronous>, transform_indices = @transform_6, window_bounds = array<i64: 1, 64>}, {pipeline_mode = #tpu.pipeline_mode<synchronous>, transform_indices = @transform_7, window_bounds = array<i64: 32, 32>}, {pipeline_mode = #tpu.pipeline_mode<synchronous>, transform_indices = @transform_8, window_bounds = array<i64: 1, 32>}, {pipeline_mode = #tpu.pipeline_mode<synchronous>, transform_indices = @transform_9, window_bounds = array<i64: 1, 32>}, {pipeline_mode = #tpu.pipeline_mode<synchronous>, transform_indices = @transform_10, window_bounds = array<i64: 1, 32>}, {transform_indices = @transform_11, window_bounds = array<i64: 1, 8, 32>}]} {
    %c0 = arith.constant 0 : index
    %c0_0 = arith.constant 0 : index
    %c0_1 = arith.constant 0 : index
    %0 = vector.load %arg1[%c0, %c0_0, %c0_1] : memref<1x8x32xf32, #tpu.memory_space<vmem>>, vector<1x8x32xf32>
    %1 = vector.shape_cast %0 : vector<1x8x32xf32> to vector<8x32xf32>
    %c0_2 = arith.constant 0 : index
    %c0_3 = arith.constant 0 : index
    %c0_4 = arith.constant 0 : index
    %2 = vector.load %arg2[%c0_2, %c0_3, %c0_4] : memref<1x8x32xf32, #tpu.memory_space<vmem>>, vector<1x8x32xf32>
    %3 = vector.shape_cast %2 : vector<1x8x32xf32> to vector<8x32xf32>
    %c0_5 = arith.constant 0 : index
    %c0_6 = arith.constant 0 : index
    %c0_7 = arith.constant 0 : index
    %4 = vector.load %arg3[%c0_5, %c0_6, %c0_7] : memref<1x8x8xf32, #tpu.memory_space<vmem>>, vector<1x8x8xf32>
    %5 = vector.shape_cast %4 : vector<1x8x8xf32> to vector<8x8xf32>
    %6 = arith.truncf %1 : vector<8x32xf32> to vector<8x32xbf16>
    %7 = arith.truncf %3 : vector<8x32xf32> to vector<8x32xbf16>
    %c0_8 = arith.constant 0 : index
    %c0_9 = arith.constant 0 : index
    %8 = vector.load %arg4[%c0_8, %c0_9] : memref<32x32xbf16, #tpu.memory_space<vmem>>, vector<32x32xbf16>
    %cst = arith.constant dense<0.000000e+00> : vector<8x32xf32>
    %9 = tpu.matmul %6, %8, %cst {dimension_numbers = #tpu.dot_dimension_numbers<[1], [0], [0], [1], [0, 0, 1, 1], [], []>} : vector<8x32xbf16>, vector<32x32xbf16>, vector<8x32xf32> -> vector<8x32xf32>
    %c0_10 = arith.constant 0 : index
    %c0_11 = arith.constant 0 : index
    %10 = vector.load %arg5[%c0_10, %c0_11] : memref<1x32xf32, #tpu.memory_space<vmem>>, vector<1x32xf32>
    %11 = vector.broadcast %10 : vector<1x32xf32> to vector<8x32xf32>
    %12 = arith.addf %9, %11 : vector<8x32xf32>
    %c0_12 = arith.constant 0 : index
    %c0_13 = arith.constant 0 : index
    %13 = vector.load %arg6[%c0_12, %c0_13] : memref<32x64xbf16, #tpu.memory_space<vmem>>, vector<32x64xbf16>
    %cst_14 = arith.constant dense<0.000000e+00> : vector<8x64xf32>
    %14 = tpu.matmul %7, %13, %cst_14 {dimension_numbers = #tpu.dot_dimension_numbers<[1], [0], [0], [1], [0, 0, 1, 1], [], []>} : vector<8x32xbf16>, vector<32x64xbf16>, vector<8x64xf32> -> vector<8x64xf32>
    %c0_15 = arith.constant 0 : index
    %c0_16 = arith.constant 0 : index
    %15 = vector.load %arg7[%c0_15, %c0_16] : memref<1x64xf32, #tpu.memory_space<vmem>>, vector<1x64xf32>
    %16 = vector.broadcast %15 : vector<1x64xf32> to vector<8x64xf32>
    %17 = arith.addf %14, %16 : vector<8x64xf32>
    %18 = vector.extract_strided_slice %17 {offsets = [0, 0], sizes = [8, 32], strides = [1, 1]} : vector<8x64xf32> to vector<8x32xf32>
    %19 = vector.extract_strided_slice %17 {offsets = [0, 32], sizes = [8, 32], strides = [1, 1]} : vector<8x64xf32> to vector<8x32xf32>
    %cst_17 = arith.constant 0.000000e+00 : f32
    %20 = vector.broadcast %cst_17 : f32 to vector<8x32xf32>
    %21 = vector.extract_strided_slice %12 {offsets = [0, 0], sizes = [8, 8], strides = [1, 1]} : vector<8x32xf32> to vector<8x8xf32>
    %22 = arith.truncf %21 : vector<8x8xf32> to vector<8x8xbf16>
    %23 = vector.extract_strided_slice %18 {offsets = [0, 0], sizes = [8, 8], strides = [1, 1]} : vector<8x32xf32> to vector<8x8xf32>
    %24 = arith.truncf %23 : vector<8x8xf32> to vector<8x8xbf16>
    %25 = vector.extract_strided_slice %19 {offsets = [0, 0], sizes = [8, 8], strides = [1, 1]} : vector<8x32xf32> to vector<8x8xf32>
    %26 = arith.truncf %25 : vector<8x8xf32> to vector<8x8xbf16>
    %cst_18 = arith.constant dense<0.000000e+00> : vector<8x8xf32>
    %27 = tpu.matmul %22, %24, %cst_18 {dimension_numbers = #tpu.dot_dimension_numbers<[1], [1], [0], [0], [0, 0, 1, 0], [], []>} : vector<8x8xbf16>, vector<8x8xbf16>, vector<8x8xf32> -> vector<8x8xf32>
    %cst_19 = arith.constant 0.353553385 : f32
    %28 = vector.broadcast %cst_19 : f32 to vector<8x8xf32>
    %29 = arith.mulf %27, %28 : vector<8x8xf32>
    %30 = arith.addf %29, %5 : vector<8x8xf32>
    %cst_20 = arith.constant dense<0xFF800000> : vector<8xf32>
    %31 = vector.multi_reduction <maximumf>, %30, %cst_20 [1] : vector<8x8xf32> to vector<8xf32>
    %32 = vector.shape_cast %31 : vector<8xf32> to vector<8x1xf32>
    %33 = vector.broadcast %32 : vector<8x1xf32> to vector<8x8xf32>
    %34 = arith.subf %30, %33 : vector<8x8xf32>
    %35 = math.exp %34 : vector<8x8xf32>
    %cst_21 = arith.constant dense<0.000000e+00> : vector<8xf32>
    %36 = vector.multi_reduction <add>, %35, %cst_21 [1] : vector<8x8xf32> to vector<8xf32>
    %37 = vector.shape_cast %36 : vector<8xf32> to vector<8x1xf32>
    %38 = tpu.reciprocal %37 {approx = true} : vector<8x1xf32> -> vector<8x1xf32>
    %39 = vector.broadcast %38 : vector<8x1xf32> to vector<8x8xf32>
    %40 = arith.mulf %35, %39 : vector<8x8xf32>
    %41 = arith.truncf %40 : vector<8x8xf32> to vector<8x8xbf16>
    %cst_22 = arith.constant dense<0.000000e+00> : vector<8x8xf32>
    %42 = tpu.matmul %41, %26, %cst_22 {dimension_numbers = #tpu.dot_dimension_numbers<[1], [0], [0], [1], [0, 0, 1, 1], [], []>} : vector<8x8xbf16>, vector<8x8xbf16>, vector<8x8xf32> -> vector<8x8xf32>
    %43 = arith.truncf %42 : vector<8x8xf32> to vector<8x8xbf16>
    %c0_23 = arith.constant 0 : index
    %c0_24 = arith.constant 0 : index
    %44 = vector.load %arg8[%c0_23, %c0_24] : memref<32x32xbf16, #tpu.memory_space<vmem>>, vector<8x32xbf16>
    %cst_25 = arith.constant dense<0.000000e+00> : vector<8x32xf32>
    %45 = tpu.matmul %43, %44, %cst_25 {dimension_numbers = #tpu.dot_dimension_numbers<[1], [0], [0], [1], [0, 0, 1, 1], [], []>} : vector<8x8xbf16>, vector<8x32xbf16>, vector<8x32xf32> -> vector<8x32xf32>
    %46 = arith.addf %20, %45 : vector<8x32xf32>
    %47 = vector.extract_strided_slice %12 {offsets = [0, 8], sizes = [8, 8], strides = [1, 1]} : vector<8x32xf32> to vector<8x8xf32>
    %48 = arith.truncf %47 : vector<8x8xf32> to vector<8x8xbf16>
    %49 = vector.extract_strided_slice %18 {offsets = [0, 8], sizes = [8, 8], strides = [1, 1]} : vector<8x32xf32> to vector<8x8xf32>
    %50 = arith.truncf %49 : vector<8x8xf32> to vector<8x8xbf16>
    %51 = vector.extract_strided_slice %19 {offsets = [0, 8], sizes = [8, 8], strides = [1, 1]} : vector<8x32xf32> to vector<8x8xf32>
    %52 = arith.truncf %51 : vector<8x8xf32> to vector<8x8xbf16>
    %cst_26 = arith.constant dense<0.000000e+00> : vector<8x8xf32>
    %53 = tpu.matmul %48, %50, %cst_26 {dimension_numbers = #tpu.dot_dimension_numbers<[1], [1], [0], [0], [0, 0, 1, 0], [], []>} : vector<8x8xbf16>, vector<8x8xbf16>, vector<8x8xf32> -> vector<8x8xf32>
    %cst_27 = arith.constant 0.353553385 : f32
    %54 = vector.broadcast %cst_27 : f32 to vector<8x8xf32>
    %55 = arith.mulf %53, %54 : vector<8x8xf32>
    %56 = arith.addf %55, %5 : vector<8x8xf32>
    %cst_28 = arith.constant dense<0xFF800000> : vector<8xf32>
    %57 = vector.multi_reduction <maximumf>, %56, %cst_28 [1] : vector<8x8xf32> to vector<8xf32>
    %58 = vector.shape_cast %57 : vector<8xf32> to vector<8x1xf32>
    %59 = vector.broadcast %58 : vector<8x1xf32> to vector<8x8xf32>
    %60 = arith.subf %56, %59 : vector<8x8xf32>
    %61 = math.exp %60 : vector<8x8xf32>
    %cst_29 = arith.constant dense<0.000000e+00> : vector<8xf32>
    %62 = vector.multi_reduction <add>, %61, %cst_29 [1] : vector<8x8xf32> to vector<8xf32>
    %63 = vector.shape_cast %62 : vector<8xf32> to vector<8x1xf32>
    %64 = tpu.reciprocal %63 {approx = true} : vector<8x1xf32> -> vector<8x1xf32>
    %65 = vector.broadcast %64 : vector<8x1xf32> to vector<8x8xf32>
    %66 = arith.mulf %61, %65 : vector<8x8xf32>
    %67 = arith.truncf %66 : vector<8x8xf32> to vector<8x8xbf16>
    %cst_30 = arith.constant dense<0.000000e+00> : vector<8x8xf32>
    %68 = tpu.matmul %67, %52, %cst_30 {dimension_numbers = #tpu.dot_dimension_numbers<[1], [0], [0], [1], [0, 0, 1, 1], [], []>} : vector<8x8xbf16>, vector<8x8xbf16>, vector<8x8xf32> -> vector<8x8xf32>
    %69 = arith.truncf %68 : vector<8x8xf32> to vector<8x8xbf16>
    %c8 = arith.constant 8 : index
    %c0_31 = arith.constant 0 : index
    %70 = vector.load %arg8[%c8, %c0_31] : memref<32x32xbf16, #tpu.memory_space<vmem>>, vector<8x32xbf16>
    %cst_32 = arith.constant dense<0.000000e+00> : vector<8x32xf32>
    %71 = tpu.matmul %69, %70, %cst_32 {dimension_numbers = #tpu.dot_dimension_numbers<[1], [0], [0], [1], [0, 0, 1, 1], [], []>} : vector<8x8xbf16>, vector<8x32xbf16>, vector<8x32xf32> -> vector<8x32xf32>
    %72 = arith.addf %46, %71 : vector<8x32xf32>
    %73 = vector.extract_strided_slice %12 {offsets = [0, 16], sizes = [8, 8], strides = [1, 1]} : vector<8x32xf32> to vector<8x8xf32>
    %74 = arith.truncf %73 : vector<8x8xf32> to vector<8x8xbf16>
    %75 = vector.extract_strided_slice %18 {offsets = [0, 16], sizes = [8, 8], strides = [1, 1]} : vector<8x32xf32> to vector<8x8xf32>
    %76 = arith.truncf %75 : vector<8x8xf32> to vector<8x8xbf16>
    %77 = vector.extract_strided_slice %19 {offsets = [0, 16], sizes = [8, 8], strides = [1, 1]} : vector<8x32xf32> to vector<8x8xf32>
    %78 = arith.truncf %77 : vector<8x8xf32> to vector<8x8xbf16>
    %cst_33 = arith.constant dense<0.000000e+00> : vector<8x8xf32>
    %79 = tpu.matmul %74, %76, %cst_33 {dimension_numbers = #tpu.dot_dimension_numbers<[1], [1], [0], [0], [0, 0, 1, 0], [], []>} : vector<8x8xbf16>, vector<8x8xbf16>, vector<8x8xf32> -> vector<8x8xf32>
    %cst_34 = arith.constant 0.353553385 : f32
    %80 = vector.broadcast %cst_34 : f32 to vector<8x8xf32>
    %81 = arith.mulf %79, %80 : vector<8x8xf32>
    %82 = arith.addf %81, %5 : vector<8x8xf32>
    %cst_35 = arith.constant dense<0xFF800000> : vector<8xf32>
    %83 = vector.multi_reduction <maximumf>, %82, %cst_35 [1] : vector<8x8xf32> to vector<8xf32>
    %84 = vector.shape_cast %83 : vector<8xf32> to vector<8x1xf32>
    %85 = vector.broadcast %84 : vector<8x1xf32> to vector<8x8xf32>
    %86 = arith.subf %82, %85 : vector<8x8xf32>
    %87 = math.exp %86 : vector<8x8xf32>
    %cst_36 = arith.constant dense<0.000000e+00> : vector<8xf32>
    %88 = vector.multi_reduction <add>, %87, %cst_36 [1] : vector<8x8xf32> to vector<8xf32>
    %89 = vector.shape_cast %88 : vector<8xf32> to vector<8x1xf32>
    %90 = tpu.reciprocal %89 {approx = true} : vector<8x1xf32> -> vector<8x1xf32>
    %91 = vector.broadcast %90 : vector<8x1xf32> to vector<8x8xf32>
    %92 = arith.mulf %87, %91 : vector<8x8xf32>
    %93 = arith.truncf %92 : vector<8x8xf32> to vector<8x8xbf16>
    %cst_37 = arith.constant dense<0.000000e+00> : vector<8x8xf32>
    %94 = tpu.matmul %93, %78, %cst_37 {dimension_numbers = #tpu.dot_dimension_numbers<[1], [0], [0], [1], [0, 0, 1, 1], [], []>} : vector<8x8xbf16>, vector<8x8xbf16>, vector<8x8xf32> -> vector<8x8xf32>
    %95 = arith.truncf %94 : vector<8x8xf32> to vector<8x8xbf16>
    %c16 = arith.constant 16 : index
    %c0_38 = arith.constant 0 : index
    %96 = vector.load %arg8[%c16, %c0_38] : memref<32x32xbf16, #tpu.memory_space<vmem>>, vector<8x32xbf16>
    %cst_39 = arith.constant dense<0.000000e+00> : vector<8x32xf32>
    %97 = tpu.matmul %95, %96, %cst_39 {dimension_numbers = #tpu.dot_dimension_numbers<[1], [0], [0], [1], [0, 0, 1, 1], [], []>} : vector<8x8xbf16>, vector<8x32xbf16>, vector<8x32xf32> -> vector<8x32xf32>
    %98 = arith.addf %72, %97 : vector<8x32xf32>
    %99 = vector.extract_strided_slice %12 {offsets = [0, 24], sizes = [8, 8], strides = [1, 1]} : vector<8x32xf32> to vector<8x8xf32>
    %100 = arith.truncf %99 : vector<8x8xf32> to vector<8x8xbf16>
    %101 = vector.extract_strided_slice %18 {offsets = [0, 24], sizes = [8, 8], strides = [1, 1]} : vector<8x32xf32> to vector<8x8xf32>
    %102 = arith.truncf %101 : vector<8x8xf32> to vector<8x8xbf16>
    %103 = vector.extract_strided_slice %19 {offsets = [0, 24], sizes = [8, 8], strides = [1, 1]} : vector<8x32xf32> to vector<8x8xf32>
    %104 = arith.truncf %103 : vector<8x8xf32> to vector<8x8xbf16>
    %cst_40 = arith.constant dense<0.000000e+00> : vector<8x8xf32>
    %105 = tpu.matmul %100, %102, %cst_40 {dimension_numbers = #tpu.dot_dimension_numbers<[1], [1], [0], [0], [0, 0, 1, 0], [], []>} : vector<8x8xbf16>, vector<8x8xbf16>, vector<8x8xf32> -> vector<8x8xf32>
    %cst_41 = arith.constant 0.353553385 : f32
    %106 = vector.broadcast %cst_41 : f32 to vector<8x8xf32>
    %107 = arith.mulf %105, %106 : vector<8x8xf32>
    %108 = arith.addf %107, %5 : vector<8x8xf32>
    %cst_42 = arith.constant dense<0xFF800000> : vector<8xf32>
    %109 = vector.multi_reduction <maximumf>, %108, %cst_42 [1] : vector<8x8xf32> to vector<8xf32>
    %110 = vector.shape_cast %109 : vector<8xf32> to vector<8x1xf32>
    %111 = vector.broadcast %110 : vector<8x1xf32> to vector<8x8xf32>
    %112 = arith.subf %108, %111 : vector<8x8xf32>
    %113 = math.exp %112 : vector<8x8xf32>
    %cst_43 = arith.constant dense<0.000000e+00> : vector<8xf32>
    %114 = vector.multi_reduction <add>, %113, %cst_43 [1] : vector<8x8xf32> to vector<8xf32>
    %115 = vector.shape_cast %114 : vector<8xf32> to vector<8x1xf32>
    %116 = tpu.reciprocal %115 {approx = true} : vector<8x1xf32> -> vector<8x1xf32>
    %117 = vector.broadcast %116 : vector<8x1xf32> to vector<8x8xf32>
    %118 = arith.mulf %113, %117 : vector<8x8xf32>
    %119 = arith.truncf %118 : vector<8x8xf32> to vector<8x8xbf16>
    %cst_44 = arith.constant dense<0.000000e+00> : vector<8x8xf32>
    %120 = tpu.matmul %119, %104, %cst_44 {dimension_numbers = #tpu.dot_dimension_numbers<[1], [0], [0], [1], [0, 0, 1, 1], [], []>} : vector<8x8xbf16>, vector<8x8xbf16>, vector<8x8xf32> -> vector<8x8xf32>
    %121 = arith.truncf %120 : vector<8x8xf32> to vector<8x8xbf16>
    %c24 = arith.constant 24 : index
    %c0_45 = arith.constant 0 : index
    %122 = vector.load %arg8[%c24, %c0_45] : memref<32x32xbf16, #tpu.memory_space<vmem>>, vector<8x32xbf16>
    %cst_46 = arith.constant dense<0.000000e+00> : vector<8x32xf32>
    %123 = tpu.matmul %121, %122, %cst_46 {dimension_numbers = #tpu.dot_dimension_numbers<[1], [0], [0], [1], [0, 0, 1, 1], [], []>} : vector<8x8xbf16>, vector<8x32xbf16>, vector<8x32xf32> -> vector<8x32xf32>
    %124 = arith.addf %98, %123 : vector<8x32xf32>
    %125 = arith.addf %1, %124 : vector<8x32xf32>
    %c0_47 = arith.constant 0 : index
    %c0_48 = arith.constant 0 : index
    %126 = vector.load %arg9[%c0_47, %c0_48] : memref<1x32xf32, #tpu.memory_space<vmem>>, vector<1x32xf32>
    %127 = vector.broadcast %126 : vector<1x32xf32> to vector<8x32xf32>
    %128 = arith.addf %125, %127 : vector<8x32xf32>
    %c0_49 = arith.constant 0 : index
    %c0_50 = arith.constant 0 : index
    %129 = vector.load %arg10[%c0_49, %c0_50] : memref<1x32xf32, #tpu.memory_space<vmem>>, vector<1x32xf32>
    %c0_51 = arith.constant 0 : index
    %c0_52 = arith.constant 0 : index
    %130 = vector.load %arg11[%c0_51, %c0_52] : memref<1x32xf32, #tpu.memory_space<vmem>>, vector<1x32xf32>
    %cst_53 = arith.constant dense<0.000000e+00> : vector<8xf32>
    %131 = vector.multi_reduction <add>, %128, %cst_53 [1] : vector<8x32xf32> to vector<8xf32>
    %132 = vector.shape_cast %131 : vector<8xf32> to vector<8x1xf32>
    %cst_54 = arith.constant 3.200000e+01 : f32
    %133 = vector.broadcast %cst_54 : f32 to vector<8x1xf32>
    %134 = arith.divf %132, %133 : vector<8x1xf32>
    %135 = vector.broadcast %134 : vector<8x1xf32> to vector<8x32xf32>
    %136 = arith.subf %128, %135 : vector<8x32xf32>
    %137 = arith.mulf %136, %136 : vector<8x32xf32>
    %cst_55 = arith.constant dense<0.000000e+00> : vector<8xf32>
    %138 = vector.multi_reduction <add>, %137, %cst_55 [1] : vector<8x32xf32> to vector<8xf32>
    %139 = vector.shape_cast %138 : vector<8xf32> to vector<8x1xf32>
    %cst_56 = arith.constant 3.200000e+01 : f32
    %140 = vector.broadcast %cst_56 : f32 to vector<8x1xf32>
    %141 = arith.divf %139, %140 : vector<8x1xf32>
    %142 = vector.broadcast %134 : vector<8x1xf32> to vector<8x32xf32>
    %143 = arith.subf %128, %142 : vector<8x32xf32>
    %cst_57 = arith.constant 9.99999974E-6 : f32
    %144 = vector.broadcast %cst_57 : f32 to vector<8x1xf32>
    %145 = arith.addf %141, %144 : vector<8x1xf32>
    %146 = math.rsqrt %145 : vector<8x1xf32>
    %147 = vector.broadcast %146 : vector<8x1xf32> to vector<8x32xf32>
    %148 = arith.mulf %143, %147 : vector<8x32xf32>
    %149 = vector.broadcast %129 : vector<1x32xf32> to vector<8x32xf32>
    %150 = arith.mulf %148, %149 : vector<8x32xf32>
    %151 = vector.broadcast %130 : vector<1x32xf32> to vector<8x32xf32>
    %152 = arith.addf %150, %151 : vector<8x32xf32>
    %c0_58 = arith.constant 0 : index
    %c0_59 = arith.constant 0 : index
    %c0_60 = arith.constant 0 : index
    %153 = vector.load %arg12[%c0_58, %c0_59, %c0_60] : memref<1x8x32xf32, #tpu.memory_space<vmem>>, vector<1x8x32xf32>
    %154 = vector.shape_cast %153 : vector<1x8x32xf32> to vector<8x32xf32>
    %155 = vector.shape_cast %152 : vector<8x32xf32> to vector<1x8x32xf32>
    tpu.vector_store %arg12[%c0_58, %c0_59, %c0_60], %155 {strides = array<i32>} : memref<1x8x32xf32, #tpu.memory_space<vmem>>, vector<1x8x32xf32>,
    return
  }
  func.func @transform_0(%arg0: i32) -> (i32, i32, i32) {
    %c0_i32 = arith.constant 0 : i32
    %c0_i32_0 = arith.constant 0 : i32
    %c0_i32_1 = arith.constant 0 : i32
    return %arg0, %c0_i32, %c0_i32_0 : i32, i32, i32
  }
  func.func @transform_1(%arg0: i32) -> (i32, i32, i32) {
    %c0_i32 = arith.constant 0 : i32
    %c0_i32_0 = arith.constant 0 : i32
    %c0_i32_1 = arith.constant 0 : i32
    return %arg0, %c0_i32, %c0_i32_0 : i32, i32, i32
  }
  func.func @transform_2(%arg0: i32) -> (i32, i32, i32) {
    %c0_i32 = arith.constant 0 : i32
    %c0_i32_0 = arith.constant 0 : i32
    %c0_i32_1 = arith.constant 0 : i32
    return %arg0, %c0_i32, %c0_i32_0 : i32, i32, i32
  }
  func.func @transform_3(%arg0: i32) -> (i32, i32) {
    %c0_i32 = arith.constant 0 : i32
    %c0_i32_0 = arith.constant 0 : i32
    %c0_i32_1 = arith.constant 0 : i32
    return %c0_i32, %c0_i32_0 : i32, i32
  }
  func.func @transform_4(%arg0: i32) -> (i32, i32) {
    %c0_i32 = arith.constant 0 : i32
    %c0_i32_0 = arith.constant 0 : i32
    %c0_i32_1 = arith.constant 0 : i32
    return %c0_i32, %c0_i32_0 : i32, i32
  }
  func.func @transform_5(%arg0: i32) -> (i32, i32) {
    %c0_i32 = arith.constant 0 : i32
    %c0_i32_0 = arith.constant 0 : i32
    %c0_i32_1 = arith.constant 0 : i32
    return %c0_i32, %c0_i32_0 : i32, i32
  }
  func.func @transform_6(%arg0: i32) -> (i32, i32) {
    %c0_i32 = arith.constant 0 : i32
    %c0_i32_0 = arith.constant 0 : i32
    %c0_i32_1 = arith.constant 0 : i32
    return %c0_i32, %c0_i32_0 : i32, i32
  }
  func.func @transform_7(%arg0: i32) -> (i32, i32) {
    %c0_i32 = arith.constant 0 : i32
    %c0_i32_0 = arith.constant 0 : i32
    %c0_i32_1 = arith.constant 0 : i32
    return %c0_i32, %c0_i32_0 : i32, i32
  }
  func.func @transform_8(%arg0: i32) -> (i32, i32) {
    %c0_i32 = arith.constant 0 : i32
    %c0_i32_0 = arith.constant 0 : i32
    %c0_i32_1 = arith.constant 0 : i32
    return %c0_i32, %c0_i32_0 : i32, i32
  }
  func.func @transform_9(%arg0: i32) -> (i32, i32) {
    %c0_i32 = arith.constant 0 : i32
    %c0_i32_0 = arith.constant 0 : i32
    %c0_i32_1 = arith.constant 0 : i32
    return %c0_i32, %c0_i32_0 : i32, i32
  }
  func.func @transform_10(%arg0: i32) -> (i32, i32) {
    %c0_i32 = arith.constant 0 : i32
    %c0_i32_0 = arith.constant 0 : i32
    %c0_i32_1 = arith.constant 0 : i32
    return %c0_i32, %c0_i32_0 : i32, i32
  }
  func.func @transform_11(%arg0: i32) -> (i32, i32, i32) {
    %c0_i32 = arith.constant 0 : i32
    %c0_i32_0 = arith.constant 0 : i32
    %c0_i32_1 = arith.constant 0 : i32
    return %arg0, %c0_i32, %c0_i32_0 : i32, i32, i32
  }
}

module attributes {stable_mosaic.version = 11 : i64} {
  func.func @_mha_ln_kernel(%arg0: i32, %arg1: memref<1x8x32xf32, #tpu.memory_space<vmem>>, %arg2: memref<1x10x32xf32, #tpu.memory_space<vmem>>, %arg3: memref<1x1x10xf32, #tpu.memory_space<vmem>>, %arg4: memref<32x32xbf16, #tpu.memory_space<vmem>>, %arg5: memref<1x32xf32, #tpu.memory_space<vmem>>, %arg6: memref<32x64xbf16, #tpu.memory_space<vmem>>, %arg7: memref<1x64xf32, #tpu.memory_space<vmem>>, %arg8: memref<32x32xbf16, #tpu.memory_space<vmem>>, %arg9: memref<1x32xf32, #tpu.memory_space<vmem>>, %arg10: memref<1x32xf32, #tpu.memory_space<vmem>>, %arg11: memref<1x32xf32, #tpu.memory_space<vmem>>, %arg12: memref<1x8x32xf32, #tpu.memory_space<vmem>>) attributes {dimension_semantics = [#tpu.dimension_semantics<parallel>], iteration_bounds = array<i64: 2>, scalar_prefetch = 0 : i64, scratch_operands = 0 : i64, tpu.core_type = #tpu.core_type<tc>, window_params = [{transform_indices = @transform_0, window_bounds = array<i64: 1, 8, 32>}, {transform_indices = @transform_1, window_bounds = array<i64: 1, 10, 32>}, {transform_indices = @transform_2, window_bounds = array<i64: 1, 1, 10>}, {pipeline_mode = #tpu.pipeline_mode<synchronous>, transform_indices = @transform_3, window_bounds = array<i64: 32, 32>}, {pipeline_mode = #tpu.pipeline_mode<synchronous>, transform_indices = @transform_4, window_bounds = array<i64: 1, 32>}, {pipeline_mode = #tpu.pipeline_mode<synchronous>, transform_indices = @transform_5, window_bounds = array<i64: 32, 64>}, {pipeline_mode = #tpu.pipeline_mode<synchronous>, transform_indices = @transform_6, window_bounds = array<i64: 1, 64>}, {pipeline_mode = #tpu.pipeline_mode<synchronous>, transform_indices = @transform_7, window_bounds = array<i64: 32, 32>}, {pipeline_mode = #tpu.pipeline_mode<synchronous>, transform_indices = @transform_8, window_bounds = array<i64: 1, 32>}, {pipeline_mode = #tpu.pipeline_mode<synchronous>, transform_indices = @transform_9, window_bounds = array<i64: 1, 32>}, {pipeline_mode = #tpu.pipeline_mode<synchronous>, transform_indices = @transform_10, window_bounds = array<i64: 1, 32>}, {transform_indices = @transform_11, window_bounds = array<i64: 1, 8, 32>}]} {
    %c0 = arith.constant 0 : index
    %c0_0 = arith.constant 0 : index
    %c0_1 = arith.constant 0 : index
    %0 = vector.load %arg1[%c0, %c0_0, %c0_1] : memref<1x8x32xf32, #tpu.memory_space<vmem>>, vector<1x8x32xf32>
    %1 = vector.shape_cast %0 : vector<1x8x32xf32> to vector<8x32xf32>
    %c0_2 = arith.constant 0 : index
    %c0_3 = arith.constant 0 : index
    %c0_4 = arith.constant 0 : index
    %2 = vector.load %arg2[%c0_2, %c0_3, %c0_4] : memref<1x10x32xf32, #tpu.memory_space<vmem>>, vector<1x10x32xf32>
    %3 = vector.shape_cast %2 : vector<1x10x32xf32> to vector<10x32xf32>
    %c0_5 = arith.constant 0 : index
    %c0_6 = arith.constant 0 : index
    %c0_7 = arith.constant 0 : index
    %4 = vector.load %arg3[%c0_5, %c0_6, %c0_7] : memref<1x1x10xf32, #tpu.memory_space<vmem>>, vector<1x1x10xf32>
    %5 = vector.shape_cast %4 : vector<1x1x10xf32> to vector<1x10xf32>
    %6 = arith.truncf %1 : vector<8x32xf32> to vector<8x32xbf16>
    %7 = arith.truncf %3 : vector<10x32xf32> to vector<10x32xbf16>
    %c0_8 = arith.constant 0 : index
    %c0_9 = arith.constant 0 : index
    %8 = vector.load %arg4[%c0_8, %c0_9] : memref<32x32xbf16, #tpu.memory_space<vmem>>, vector<32x32xbf16>
    %cst = arith.constant dense<0.000000e+00> : vector<8x32xf32>
    %9 = tpu.matmul %6, %8, %cst {dimension_numbers = #tpu.dot_dimension_numbers<[1], [0], [0], [1], [0, 0, 1, 1], [], []>} : vector<8x32xbf16>, vector<32x32xbf16>, vector<8x32xf32> -> vector<8x32xf32>
    %c0_10 = arith.constant 0 : index
    %c0_11 = arith.constant 0 : index
    %10 = vector.load %arg5[%c0_10, %c0_11] : memref<1x32xf32, #tpu.memory_space<vmem>>, vector<1x32xf32>
    %11 = vector.broadcast %10 : vector<1x32xf32> to vector<8x32xf32>
    %12 = arith.addf %9, %11 : vector<8x32xf32>
    %c0_12 = arith.constant 0 : index
    %c0_13 = arith.constant 0 : index
    %13 = vector.load %arg6[%c0_12, %c0_13] : memref<32x64xbf16, #tpu.memory_space<vmem>>, vector<32x64xbf16>
    %cst_14 = arith.constant dense<0.000000e+00> : vector<10x64xf32>
    %14 = tpu.matmul %7, %13, %cst_14 {dimension_numbers = #tpu.dot_dimension_numbers<[1], [0], [0], [1], [0, 0, 1, 1], [], []>} : vector<10x32xbf16>, vector<32x64xbf16>, vector<10x64xf32> -> vector<10x64xf32>
    %c0_15 = arith.constant 0 : index
    %c0_16 = arith.constant 0 : index
    %15 = vector.load %arg7[%c0_15, %c0_16] : memref<1x64xf32, #tpu.memory_space<vmem>>, vector<1x64xf32>
    %16 = vector.broadcast %15 : vector<1x64xf32> to vector<10x64xf32>
    %17 = arith.addf %14, %16 : vector<10x64xf32>
    %18 = vector.extract_strided_slice %17 {offsets = [0, 0], sizes = [10, 32], strides = [1, 1]} : vector<10x64xf32> to vector<10x32xf32>
    %19 = vector.extract_strided_slice %17 {offsets = [0, 32], sizes = [10, 32], strides = [1, 1]} : vector<10x64xf32> to vector<10x32xf32>
    %cst_17 = arith.constant 0.000000e+00 : f32
    %20 = vector.broadcast %cst_17 : f32 to vector<8x32xf32>
    %21 = vector.extract_strided_slice %12 {offsets = [0, 0], sizes = [8, 8], strides = [1, 1]} : vector<8x32xf32> to vector<8x8xf32>
    %22 = arith.truncf %21 : vector<8x8xf32> to vector<8x8xbf16>
    %23 = vector.extract_strided_slice %18 {offsets = [0, 0], sizes = [10, 8], strides = [1, 1]} : vector<10x32xf32> to vector<10x8xf32>
    %24 = arith.truncf %23 : vector<10x8xf32> to vector<10x8xbf16>
    %25 = vector.extract_strided_slice %19 {offsets = [0, 0], sizes = [10, 8], strides = [1, 1]} : vector<10x32xf32> to vector<10x8xf32>
    %26 = arith.truncf %25 : vector<10x8xf32> to vector<10x8xbf16>
    %cst_18 = arith.constant dense<0.000000e+00> : vector<8x10xf32>
    %27 = tpu.matmul %22, %24, %cst_18 {dimension_numbers = #tpu.dot_dimension_numbers<[1], [1], [0], [0], [0, 0, 1, 0], [], []>} : vector<8x8xbf16>, vector<10x8xbf16>, vector<8x10xf32> -> vector<8x10xf32>
    %cst_19 = arith.constant 0.353553385 : f32
    %28 = vector.broadcast %cst_19 : f32 to vector<8x10xf32>
    %29 = arith.mulf %27, %28 : vector<8x10xf32>
    %30 = vector.broadcast %5 : vector<1x10xf32> to vector<8x10xf32>
    %31 = arith.addf %29, %30 : vector<8x10xf32>
    %cst_20 = arith.constant dense<0xFF800000> : vector<8xf32>
    %32 = vector.multi_reduction <maximumf>, %31, %cst_20 [1] : vector<8x10xf32> to vector<8xf32>
    %33 = vector.shape_cast %32 : vector<8xf32> to vector<8x1xf32>
    %34 = vector.broadcast %33 : vector<8x1xf32> to vector<8x10xf32>
    %35 = arith.subf %31, %34 : vector<8x10xf32>
    %36 = math.exp %35 : vector<8x10xf32>
    %cst_21 = arith.constant dense<0.000000e+00> : vector<8xf32>
    %37 = vector.multi_reduction <add>, %36, %cst_21 [1] : vector<8x10xf32> to vector<8xf32>
    %38 = vector.shape_cast %37 : vector<8xf32> to vector<8x1xf32>
    %39 = tpu.reciprocal %38 {approx = true} : vector<8x1xf32> -> vector<8x1xf32>
    %40 = vector.broadcast %39 : vector<8x1xf32> to vector<8x10xf32>
    %41 = arith.mulf %36, %40 : vector<8x10xf32>
    %42 = arith.truncf %41 : vector<8x10xf32> to vector<8x10xbf16>
    %cst_22 = arith.constant dense<0.000000e+00> : vector<8x8xf32>
    %43 = tpu.matmul %42, %26, %cst_22 {dimension_numbers = #tpu.dot_dimension_numbers<[1], [0], [0], [1], [0, 0, 1, 1], [], []>} : vector<8x10xbf16>, vector<10x8xbf16>, vector<8x8xf32> -> vector<8x8xf32>
    %44 = arith.truncf %43 : vector<8x8xf32> to vector<8x8xbf16>
    %c0_23 = arith.constant 0 : index
    %c0_24 = arith.constant 0 : index
    %45 = vector.load %arg8[%c0_23, %c0_24] : memref<32x32xbf16, #tpu.memory_space<vmem>>, vector<8x32xbf16>
    %cst_25 = arith.constant dense<0.000000e+00> : vector<8x32xf32>
    %46 = tpu.matmul %44, %45, %cst_25 {dimension_numbers = #tpu.dot_dimension_numbers<[1], [0], [0], [1], [0, 0, 1, 1], [], []>} : vector<8x8xbf16>, vector<8x32xbf16>, vector<8x32xf32> -> vector<8x32xf32>
    %47 = arith.addf %20, %46 : vector<8x32xf32>
    %48 = vector.extract_strided_slice %12 {offsets = [0, 8], sizes = [8, 8], strides = [1, 1]} : vector<8x32xf32> to vector<8x8xf32>
    %49 = arith.truncf %48 : vector<8x8xf32> to vector<8x8xbf16>
    %50 = vector.extract_strided_slice %18 {offsets = [0, 8], sizes = [10, 8], strides = [1, 1]} : vector<10x32xf32> to vector<10x8xf32>
    %51 = arith.truncf %50 : vector<10x8xf32> to vector<10x8xbf16>
    %52 = vector.extract_strided_slice %19 {offsets = [0, 8], sizes = [10, 8], strides = [1, 1]} : vector<10x32xf32> to vector<10x8xf32>
    %53 = arith.truncf %52 : vector<10x8xf32> to vector<10x8xbf16>
    %cst_26 = arith.constant dense<0.000000e+00> : vector<8x10xf32>
    %54 = tpu.matmul %49, %51, %cst_26 {dimension_numbers = #tpu.dot_dimension_numbers<[1], [1], [0], [0], [0, 0, 1, 0], [], []>} : vector<8x8xbf16>, vector<10x8xbf16>, vector<8x10xf32> -> vector<8x10xf32>
    %cst_27 = arith.constant 0.353553385 : f32
    %55 = vector.broadcast %cst_27 : f32 to vector<8x10xf32>
    %56 = arith.mulf %54, %55 : vector<8x10xf32>
    %57 = vector.broadcast %5 : vector<1x10xf32> to vector<8x10xf32>
    %58 = arith.addf %56, %57 : vector<8x10xf32>
    %cst_28 = arith.constant dense<0xFF800000> : vector<8xf32>
    %59 = vector.multi_reduction <maximumf>, %58, %cst_28 [1] : vector<8x10xf32> to vector<8xf32>
    %60 = vector.shape_cast %59 : vector<8xf32> to vector<8x1xf32>
    %61 = vector.broadcast %60 : vector<8x1xf32> to vector<8x10xf32>
    %62 = arith.subf %58, %61 : vector<8x10xf32>
    %63 = math.exp %62 : vector<8x10xf32>
    %cst_29 = arith.constant dense<0.000000e+00> : vector<8xf32>
    %64 = vector.multi_reduction <add>, %63, %cst_29 [1] : vector<8x10xf32> to vector<8xf32>
    %65 = vector.shape_cast %64 : vector<8xf32> to vector<8x1xf32>
    %66 = tpu.reciprocal %65 {approx = true} : vector<8x1xf32> -> vector<8x1xf32>
    %67 = vector.broadcast %66 : vector<8x1xf32> to vector<8x10xf32>
    %68 = arith.mulf %63, %67 : vector<8x10xf32>
    %69 = arith.truncf %68 : vector<8x10xf32> to vector<8x10xbf16>
    %cst_30 = arith.constant dense<0.000000e+00> : vector<8x8xf32>
    %70 = tpu.matmul %69, %53, %cst_30 {dimension_numbers = #tpu.dot_dimension_numbers<[1], [0], [0], [1], [0, 0, 1, 1], [], []>} : vector<8x10xbf16>, vector<10x8xbf16>, vector<8x8xf32> -> vector<8x8xf32>
    %71 = arith.truncf %70 : vector<8x8xf32> to vector<8x8xbf16>
    %c8 = arith.constant 8 : index
    %c0_31 = arith.constant 0 : index
    %72 = vector.load %arg8[%c8, %c0_31] : memref<32x32xbf16, #tpu.memory_space<vmem>>, vector<8x32xbf16>
    %cst_32 = arith.constant dense<0.000000e+00> : vector<8x32xf32>
    %73 = tpu.matmul %71, %72, %cst_32 {dimension_numbers = #tpu.dot_dimension_numbers<[1], [0], [0], [1], [0, 0, 1, 1], [], []>} : vector<8x8xbf16>, vector<8x32xbf16>, vector<8x32xf32> -> vector<8x32xf32>
    %74 = arith.addf %47, %73 : vector<8x32xf32>
    %75 = vector.extract_strided_slice %12 {offsets = [0, 16], sizes = [8, 8], strides = [1, 1]} : vector<8x32xf32> to vector<8x8xf32>
    %76 = arith.truncf %75 : vector<8x8xf32> to vector<8x8xbf16>
    %77 = vector.extract_strided_slice %18 {offsets = [0, 16], sizes = [10, 8], strides = [1, 1]} : vector<10x32xf32> to vector<10x8xf32>
    %78 = arith.truncf %77 : vector<10x8xf32> to vector<10x8xbf16>
    %79 = vector.extract_strided_slice %19 {offsets = [0, 16], sizes = [10, 8], strides = [1, 1]} : vector<10x32xf32> to vector<10x8xf32>
    %80 = arith.truncf %79 : vector<10x8xf32> to vector<10x8xbf16>
    %cst_33 = arith.constant dense<0.000000e+00> : vector<8x10xf32>
    %81 = tpu.matmul %76, %78, %cst_33 {dimension_numbers = #tpu.dot_dimension_numbers<[1], [1], [0], [0], [0, 0, 1, 0], [], []>} : vector<8x8xbf16>, vector<10x8xbf16>, vector<8x10xf32> -> vector<8x10xf32>
    %cst_34 = arith.constant 0.353553385 : f32
    %82 = vector.broadcast %cst_34 : f32 to vector<8x10xf32>
    %83 = arith.mulf %81, %82 : vector<8x10xf32>
    %84 = vector.broadcast %5 : vector<1x10xf32> to vector<8x10xf32>
    %85 = arith.addf %83, %84 : vector<8x10xf32>
    %cst_35 = arith.constant dense<0xFF800000> : vector<8xf32>
    %86 = vector.multi_reduction <maximumf>, %85, %cst_35 [1] : vector<8x10xf32> to vector<8xf32>
    %87 = vector.shape_cast %86 : vector<8xf32> to vector<8x1xf32>
    %88 = vector.broadcast %87 : vector<8x1xf32> to vector<8x10xf32>
    %89 = arith.subf %85, %88 : vector<8x10xf32>
    %90 = math.exp %89 : vector<8x10xf32>
    %cst_36 = arith.constant dense<0.000000e+00> : vector<8xf32>
    %91 = vector.multi_reduction <add>, %90, %cst_36 [1] : vector<8x10xf32> to vector<8xf32>
    %92 = vector.shape_cast %91 : vector<8xf32> to vector<8x1xf32>
    %93 = tpu.reciprocal %92 {approx = true} : vector<8x1xf32> -> vector<8x1xf32>
    %94 = vector.broadcast %93 : vector<8x1xf32> to vector<8x10xf32>
    %95 = arith.mulf %90, %94 : vector<8x10xf32>
    %96 = arith.truncf %95 : vector<8x10xf32> to vector<8x10xbf16>
    %cst_37 = arith.constant dense<0.000000e+00> : vector<8x8xf32>
    %97 = tpu.matmul %96, %80, %cst_37 {dimension_numbers = #tpu.dot_dimension_numbers<[1], [0], [0], [1], [0, 0, 1, 1], [], []>} : vector<8x10xbf16>, vector<10x8xbf16>, vector<8x8xf32> -> vector<8x8xf32>
    %98 = arith.truncf %97 : vector<8x8xf32> to vector<8x8xbf16>
    %c16 = arith.constant 16 : index
    %c0_38 = arith.constant 0 : index
    %99 = vector.load %arg8[%c16, %c0_38] : memref<32x32xbf16, #tpu.memory_space<vmem>>, vector<8x32xbf16>
    %cst_39 = arith.constant dense<0.000000e+00> : vector<8x32xf32>
    %100 = tpu.matmul %98, %99, %cst_39 {dimension_numbers = #tpu.dot_dimension_numbers<[1], [0], [0], [1], [0, 0, 1, 1], [], []>} : vector<8x8xbf16>, vector<8x32xbf16>, vector<8x32xf32> -> vector<8x32xf32>
    %101 = arith.addf %74, %100 : vector<8x32xf32>
    %102 = vector.extract_strided_slice %12 {offsets = [0, 24], sizes = [8, 8], strides = [1, 1]} : vector<8x32xf32> to vector<8x8xf32>
    %103 = arith.truncf %102 : vector<8x8xf32> to vector<8x8xbf16>
    %104 = vector.extract_strided_slice %18 {offsets = [0, 24], sizes = [10, 8], strides = [1, 1]} : vector<10x32xf32> to vector<10x8xf32>
    %105 = arith.truncf %104 : vector<10x8xf32> to vector<10x8xbf16>
    %106 = vector.extract_strided_slice %19 {offsets = [0, 24], sizes = [10, 8], strides = [1, 1]} : vector<10x32xf32> to vector<10x8xf32>
    %107 = arith.truncf %106 : vector<10x8xf32> to vector<10x8xbf16>
    %cst_40 = arith.constant dense<0.000000e+00> : vector<8x10xf32>
    %108 = tpu.matmul %103, %105, %cst_40 {dimension_numbers = #tpu.dot_dimension_numbers<[1], [1], [0], [0], [0, 0, 1, 0], [], []>} : vector<8x8xbf16>, vector<10x8xbf16>, vector<8x10xf32> -> vector<8x10xf32>
    %cst_41 = arith.constant 0.353553385 : f32
    %109 = vector.broadcast %cst_41 : f32 to vector<8x10xf32>
    %110 = arith.mulf %108, %109 : vector<8x10xf32>
    %111 = vector.broadcast %5 : vector<1x10xf32> to vector<8x10xf32>
    %112 = arith.addf %110, %111 : vector<8x10xf32>
    %cst_42 = arith.constant dense<0xFF800000> : vector<8xf32>
    %113 = vector.multi_reduction <maximumf>, %112, %cst_42 [1] : vector<8x10xf32> to vector<8xf32>
    %114 = vector.shape_cast %113 : vector<8xf32> to vector<8x1xf32>
    %115 = vector.broadcast %114 : vector<8x1xf32> to vector<8x10xf32>
    %116 = arith.subf %112, %115 : vector<8x10xf32>
    %117 = math.exp %116 : vector<8x10xf32>
    %cst_43 = arith.constant dense<0.000000e+00> : vector<8xf32>
    %118 = vector.multi_reduction <add>, %117, %cst_43 [1] : vector<8x10xf32> to vector<8xf32>
    %119 = vector.shape_cast %118 : vector<8xf32> to vector<8x1xf32>
    %120 = tpu.reciprocal %119 {approx = true} : vector<8x1xf32> -> vector<8x1xf32>
    %121 = vector.broadcast %120 : vector<8x1xf32> to vector<8x10xf32>
    %122 = arith.mulf %117, %121 : vector<8x10xf32>
    %123 = arith.truncf %122 : vector<8x10xf32> to vector<8x10xbf16>
    %cst_44 = arith.constant dense<0.000000e+00> : vector<8x8xf32>
    %124 = tpu.matmul %123, %107, %cst_44 {dimension_numbers = #tpu.dot_dimension_numbers<[1], [0], [0], [1], [0, 0, 1, 1], [], []>} : vector<8x10xbf16>, vector<10x8xbf16>, vector<8x8xf32> -> vector<8x8xf32>
    %125 = arith.truncf %124 : vector<8x8xf32> to vector<8x8xbf16>
    %c24 = arith.constant 24 : index
    %c0_45 = arith.constant 0 : index
    %126 = vector.load %arg8[%c24, %c0_45] : memref<32x32xbf16, #tpu.memory_space<vmem>>, vector<8x32xbf16>
    %cst_46 = arith.constant dense<0.000000e+00> : vector<8x32xf32>
    %127 = tpu.matmul %125, %126, %cst_46 {dimension_numbers = #tpu.dot_dimension_numbers<[1], [0], [0], [1], [0, 0, 1, 1], [], []>} : vector<8x8xbf16>, vector<8x32xbf16>, vector<8x32xf32> -> vector<8x32xf32>
    %128 = arith.addf %101, %127 : vector<8x32xf32>
    %129 = arith.addf %1, %128 : vector<8x32xf32>
    %c0_47 = arith.constant 0 : index
    %c0_48 = arith.constant 0 : index
    %130 = vector.load %arg9[%c0_47, %c0_48] : memref<1x32xf32, #tpu.memory_space<vmem>>, vector<1x32xf32>
    %131 = vector.broadcast %130 : vector<1x32xf32> to vector<8x32xf32>
    %132 = arith.addf %129, %131 : vector<8x32xf32>
    %c0_49 = arith.constant 0 : index
    %c0_50 = arith.constant 0 : index
    %133 = vector.load %arg10[%c0_49, %c0_50] : memref<1x32xf32, #tpu.memory_space<vmem>>, vector<1x32xf32>
    %c0_51 = arith.constant 0 : index
    %c0_52 = arith.constant 0 : index
    %134 = vector.load %arg11[%c0_51, %c0_52] : memref<1x32xf32, #tpu.memory_space<vmem>>, vector<1x32xf32>
    %cst_53 = arith.constant dense<0.000000e+00> : vector<8xf32>
    %135 = vector.multi_reduction <add>, %132, %cst_53 [1] : vector<8x32xf32> to vector<8xf32>
    %136 = vector.shape_cast %135 : vector<8xf32> to vector<8x1xf32>
    %cst_54 = arith.constant 3.200000e+01 : f32
    %137 = vector.broadcast %cst_54 : f32 to vector<8x1xf32>
    %138 = arith.divf %136, %137 : vector<8x1xf32>
    %139 = vector.broadcast %138 : vector<8x1xf32> to vector<8x32xf32>
    %140 = arith.subf %132, %139 : vector<8x32xf32>
    %141 = arith.mulf %140, %140 : vector<8x32xf32>
    %cst_55 = arith.constant dense<0.000000e+00> : vector<8xf32>
    %142 = vector.multi_reduction <add>, %141, %cst_55 [1] : vector<8x32xf32> to vector<8xf32>
    %143 = vector.shape_cast %142 : vector<8xf32> to vector<8x1xf32>
    %cst_56 = arith.constant 3.200000e+01 : f32
    %144 = vector.broadcast %cst_56 : f32 to vector<8x1xf32>
    %145 = arith.divf %143, %144 : vector<8x1xf32>
    %146 = vector.broadcast %138 : vector<8x1xf32> to vector<8x32xf32>
    %147 = arith.subf %132, %146 : vector<8x32xf32>
    %cst_57 = arith.constant 9.99999974E-6 : f32
    %148 = vector.broadcast %cst_57 : f32 to vector<8x1xf32>
    %149 = arith.addf %145, %148 : vector<8x1xf32>
    %150 = math.rsqrt %149 : vector<8x1xf32>
    %151 = vector.broadcast %150 : vector<8x1xf32> to vector<8x32xf32>
    %152 = arith.mulf %147, %151 : vector<8x32xf32>
    %153 = vector.broadcast %133 : vector<1x32xf32> to vector<8x32xf32>
    %154 = arith.mulf %152, %153 : vector<8x32xf32>
    %155 = vector.broadcast %134 : vector<1x32xf32> to vector<8x32xf32>
    %156 = arith.addf %154, %155 : vector<8x32xf32>
    %c0_58 = arith.constant 0 : index
    %c0_59 = arith.constant 0 : index
    %c0_60 = arith.constant 0 : index
    %157 = vector.load %arg12[%c0_58, %c0_59, %c0_60] : memref<1x8x32xf32, #tpu.memory_space<vmem>>, vector<1x8x32xf32>
    %158 = vector.shape_cast %157 : vector<1x8x32xf32> to vector<8x32xf32>
    %159 = vector.shape_cast %156 : vector<8x32xf32> to vector<1x8x32xf32>
    tpu.vector_store %arg12[%c0_58, %c0_59, %c0_60], %159 {strides = array<i32>} : memref<1x8x32xf32, #tpu.memory_space<vmem>>, vector<1x8x32xf32>,
    return
  }
  func.func @transform_0(%arg0: i32) -> (i32, i32, i32) {
    %c0_i32 = arith.constant 0 : i32
    %c0_i32_0 = arith.constant 0 : i32
    %c0_i32_1 = arith.constant 0 : i32
    return %arg0, %c0_i32, %c0_i32_0 : i32, i32, i32
  }
  func.func @transform_1(%arg0: i32) -> (i32, i32, i32) {
    %c0_i32 = arith.constant 0 : i32
    %c0_i32_0 = arith.constant 0 : i32
    %c0_i32_1 = arith.constant 0 : i32
    return %arg0, %c0_i32, %c0_i32_0 : i32, i32, i32
  }
  func.func @transform_2(%arg0: i32) -> (i32, i32, i32) {
    %c0_i32 = arith.constant 0 : i32
    %c0_i32_0 = arith.constant 0 : i32
    %c0_i32_1 = arith.constant 0 : i32
    return %arg0, %c0_i32, %c0_i32_0 : i32, i32, i32
  }
  func.func @transform_3(%arg0: i32) -> (i32, i32) {
    %c0_i32 = arith.constant 0 : i32
    %c0_i32_0 = arith.constant 0 : i32
    %c0_i32_1 = arith.constant 0 : i32
    return %c0_i32, %c0_i32_0 : i32, i32
  }
  func.func @transform_4(%arg0: i32) -> (i32, i32) {
    %c0_i32 = arith.constant 0 : i32
    %c0_i32_0 = arith.constant 0 : i32
    %c0_i32_1 = arith.constant 0 : i32
    return %c0_i32, %c0_i32_0 : i32, i32
  }
  func.func @transform_5(%arg0: i32) -> (i32, i32) {
    %c0_i32 = arith.constant 0 : i32
    %c0_i32_0 = arith.constant 0 : i32
    %c0_i32_1 = arith.constant 0 : i32
    return %c0_i32, %c0_i32_0 : i32, i32
  }
  func.func @transform_6(%arg0: i32) -> (i32, i32) {
    %c0_i32 = arith.constant 0 : i32
    %c0_i32_0 = arith.constant 0 : i32
    %c0_i32_1 = arith.constant 0 : i32
    return %c0_i32, %c0_i32_0 : i32, i32
  }
  func.func @transform_7(%arg0: i32) -> (i32, i32) {
    %c0_i32 = arith.constant 0 : i32
    %c0_i32_0 = arith.constant 0 : i32
    %c0_i32_1 = arith.constant 0 : i32
    return %c0_i32, %c0_i32_0 : i32, i32
  }
  func.func @transform_8(%arg0: i32) -> (i32, i32) {
    %c0_i32 = arith.constant 0 : i32
    %c0_i32_0 = arith.constant 0 : i32
    %c0_i32_1 = arith.constant 0 : i32
    return %c0_i32, %c0_i32_0 : i32, i32
  }
  func.func @transform_9(%arg0: i32) -> (i32, i32) {
    %c0_i32 = arith.constant 0 : i32
    %c0_i32_0 = arith.constant 0 : i32
    %c0_i32_1 = arith.constant 0 : i32
    return %c0_i32, %c0_i32_0 : i32, i32
  }
  func.func @transform_10(%arg0: i32) -> (i32, i32) {
    %c0_i32 = arith.constant 0 : i32
    %c0_i32_0 = arith.constant 0 : i32
    %c0_i32_1 = arith.constant 0 : i32
    return %c0_i32, %c0_i32_0 : i32, i32
  }
  func.func @transform_11(%arg0: i32) -> (i32, i32, i32) {
    %c0_i32 = arith.constant 0 : i32
    %c0_i32_0 = arith.constant 0 : i32
    %c0_i32_1 = arith.constant 0 : i32
    return %arg0, %c0_i32, %c0_i32_0 : i32, i32, i32
  }
}

module attributes {stable_mosaic.version = 11 : i64} {
  func.func @_proj_relu_ln_kernel(%arg0: i32, %arg1: memref<20x48xf32, #tpu.memory_space<vmem>>, %arg2: memref<48x32xbf16, #tpu.memory_space<vmem>>, %arg3: memref<1x32xf32, #tpu.memory_space<vmem>>, %arg4: memref<1x32xf32, #tpu.memory_space<vmem>>, %arg5: memref<1x32xf32, #tpu.memory_space<vmem>>, %arg6: memref<20x32xf32, #tpu.memory_space<vmem>>) attributes {dimension_semantics = [#tpu.dimension_semantics<parallel>], iteration_bounds = array<i64: 1>, scalar_prefetch = 0 : i64, scratch_operands = 0 : i64, tpu.core_type = #tpu.core_type<tc>, window_params = [{transform_indices = @transform_0, window_bounds = array<i64: 20, 48>}, {pipeline_mode = #tpu.pipeline_mode<synchronous>, transform_indices = @transform_1, window_bounds = array<i64: 48, 32>}, {pipeline_mode = #tpu.pipeline_mode<synchronous>, transform_indices = @transform_2, window_bounds = array<i64: 1, 32>}, {pipeline_mode = #tpu.pipeline_mode<synchronous>, transform_indices = @transform_3, window_bounds = array<i64: 1, 32>}, {pipeline_mode = #tpu.pipeline_mode<synchronous>, transform_indices = @transform_4, window_bounds = array<i64: 1, 32>}, {transform_indices = @transform_5, window_bounds = array<i64: 20, 32>}]} {
    %c0 = arith.constant 0 : index
    %c0_0 = arith.constant 0 : index
    %0 = vector.load %arg1[%c0, %c0_0] : memref<20x48xf32, #tpu.memory_space<vmem>>, vector<20x48xf32>
    %1 = arith.truncf %0 : vector<20x48xf32> to vector<20x48xbf16>
    %c0_1 = arith.constant 0 : index
    %c0_2 = arith.constant 0 : index
    %2 = vector.load %arg2[%c0_1, %c0_2] : memref<48x32xbf16, #tpu.memory_space<vmem>>, vector<48x32xbf16>
    %cst = arith.constant dense<0.000000e+00> : vector<20x32xf32>
    %3 = tpu.matmul %1, %2, %cst {dimension_numbers = #tpu.dot_dimension_numbers<[1], [0], [0], [1], [0, 0, 1, 1], [], []>} : vector<20x48xbf16>, vector<48x32xbf16>, vector<20x32xf32> -> vector<20x32xf32>
    %c0_3 = arith.constant 0 : index
    %c0_4 = arith.constant 0 : index
    %4 = vector.load %arg3[%c0_3, %c0_4] : memref<1x32xf32, #tpu.memory_space<vmem>>, vector<1x32xf32>
    %5 = vector.broadcast %4 : vector<1x32xf32> to vector<20x32xf32>
    %6 = arith.addf %3, %5 : vector<20x32xf32>
    %cst_5 = arith.constant 0.000000e+00 : f32
    %7 = vector.broadcast %cst_5 : f32 to vector<20x32xf32>
    %8 = arith.maximumf %6, %7 : vector<20x32xf32>
    %c0_6 = arith.constant 0 : index
    %c0_7 = arith.constant 0 : index
    %9 = vector.load %arg4[%c0_6, %c0_7] : memref<1x32xf32, #tpu.memory_space<vmem>>, vector<1x32xf32>
    %c0_8 = arith.constant 0 : index
    %c0_9 = arith.constant 0 : index
    %10 = vector.load %arg5[%c0_8, %c0_9] : memref<1x32xf32, #tpu.memory_space<vmem>>, vector<1x32xf32>
    %cst_10 = arith.constant dense<0.000000e+00> : vector<20xf32>
    %11 = vector.multi_reduction <add>, %8, %cst_10 [1] : vector<20x32xf32> to vector<20xf32>
    %12 = vector.shape_cast %11 : vector<20xf32> to vector<20x1xf32>
    %cst_11 = arith.constant 3.200000e+01 : f32
    %13 = vector.broadcast %cst_11 : f32 to vector<20x1xf32>
    %14 = arith.divf %12, %13 : vector<20x1xf32>
    %15 = vector.broadcast %14 : vector<20x1xf32> to vector<20x32xf32>
    %16 = arith.subf %8, %15 : vector<20x32xf32>
    %17 = arith.mulf %16, %16 : vector<20x32xf32>
    %cst_12 = arith.constant dense<0.000000e+00> : vector<20xf32>
    %18 = vector.multi_reduction <add>, %17, %cst_12 [1] : vector<20x32xf32> to vector<20xf32>
    %19 = vector.shape_cast %18 : vector<20xf32> to vector<20x1xf32>
    %cst_13 = arith.constant 3.200000e+01 : f32
    %20 = vector.broadcast %cst_13 : f32 to vector<20x1xf32>
    %21 = arith.divf %19, %20 : vector<20x1xf32>
    %22 = vector.broadcast %14 : vector<20x1xf32> to vector<20x32xf32>
    %23 = arith.subf %8, %22 : vector<20x32xf32>
    %cst_14 = arith.constant 9.99999974E-6 : f32
    %24 = vector.broadcast %cst_14 : f32 to vector<20x1xf32>
    %25 = arith.addf %21, %24 : vector<20x1xf32>
    %26 = math.rsqrt %25 : vector<20x1xf32>
    %27 = vector.broadcast %26 : vector<20x1xf32> to vector<20x32xf32>
    %28 = arith.mulf %23, %27 : vector<20x32xf32>
    %29 = vector.broadcast %9 : vector<1x32xf32> to vector<20x32xf32>
    %30 = arith.mulf %28, %29 : vector<20x32xf32>
    %31 = vector.broadcast %10 : vector<1x32xf32> to vector<20x32xf32>
    %32 = arith.addf %30, %31 : vector<20x32xf32>
    %c0_15 = arith.constant 0 : index
    %c0_16 = arith.constant 0 : index
    %33 = vector.load %arg6[%c0_15, %c0_16] : memref<20x32xf32, #tpu.memory_space<vmem>>, vector<20x32xf32>
    tpu.vector_store %arg6[%c0_15, %c0_16], %32 {strides = array<i32>} : memref<20x32xf32, #tpu.memory_space<vmem>>, vector<20x32xf32>,
    return
  }
  func.func @transform_0(%arg0: i32) -> (i32, i32) {
    %c0_i32 = arith.constant 0 : i32
    %c0_i32_0 = arith.constant 0 : i32
    return %arg0, %c0_i32 : i32, i32
  }
  func.func @transform_1(%arg0: i32) -> (i32, i32) {
    %c0_i32 = arith.constant 0 : i32
    %c0_i32_0 = arith.constant 0 : i32
    %c0_i32_1 = arith.constant 0 : i32
    return %c0_i32, %c0_i32_0 : i32, i32
  }
  func.func @transform_2(%arg0: i32) -> (i32, i32) {
    %c0_i32 = arith.constant 0 : i32
    %c0_i32_0 = arith.constant 0 : i32
    %c0_i32_1 = arith.constant 0 : i32
    return %c0_i32, %c0_i32_0 : i32, i32
  }
  func.func @transform_3(%arg0: i32) -> (i32, i32) {
    %c0_i32 = arith.constant 0 : i32
    %c0_i32_0 = arith.constant 0 : i32
    %c0_i32_1 = arith.constant 0 : i32
    return %c0_i32, %c0_i32_0 : i32, i32
  }
  func.func @transform_4(%arg0: i32) -> (i32, i32) {
    %c0_i32 = arith.constant 0 : i32
    %c0_i32_0 = arith.constant 0 : i32
    %c0_i32_1 = arith.constant 0 : i32
    return %c0_i32, %c0_i32_0 : i32, i32
  }
  func.func @transform_5(%arg0: i32) -> (i32, i32) {
    %c0_i32 = arith.constant 0 : i32
    %c0_i32_0 = arith.constant 0 : i32
    return %arg0, %c0_i32 : i32, i32
  }
}

module attributes {stable_mosaic.version = 11 : i64} {
  func.func @_ffn_ln_kernel(%arg0: i32, %arg1: memref<16x32xf32, #tpu.memory_space<vmem>>, %arg2: memref<32x128xbf16, #tpu.memory_space<vmem>>, %arg3: memref<1x128xf32, #tpu.memory_space<vmem>>, %arg4: memref<128x32xbf16, #tpu.memory_space<vmem>>, %arg5: memref<1x32xf32, #tpu.memory_space<vmem>>, %arg6: memref<1x32xf32, #tpu.memory_space<vmem>>, %arg7: memref<1x32xf32, #tpu.memory_space<vmem>>, %arg8: memref<16x32xf32, #tpu.memory_space<vmem>>) attributes {dimension_semantics = [#tpu.dimension_semantics<parallel>], iteration_bounds = array<i64: 1>, scalar_prefetch = 0 : i64, scratch_operands = 0 : i64, tpu.core_type = #tpu.core_type<tc>, window_params = [{transform_indices = @transform_0, window_bounds = array<i64: 16, 32>}, {pipeline_mode = #tpu.pipeline_mode<synchronous>, transform_indices = @transform_1, window_bounds = array<i64: 32, 128>}, {pipeline_mode = #tpu.pipeline_mode<synchronous>, transform_indices = @transform_2, window_bounds = array<i64: 1, 128>}, {pipeline_mode = #tpu.pipeline_mode<synchronous>, transform_indices = @transform_3, window_bounds = array<i64: 128, 32>}, {pipeline_mode = #tpu.pipeline_mode<synchronous>, transform_indices = @transform_4, window_bounds = array<i64: 1, 32>}, {pipeline_mode = #tpu.pipeline_mode<synchronous>, transform_indices = @transform_5, window_bounds = array<i64: 1, 32>}, {pipeline_mode = #tpu.pipeline_mode<synchronous>, transform_indices = @transform_6, window_bounds = array<i64: 1, 32>}, {transform_indices = @transform_7, window_bounds = array<i64: 16, 32>}]} {
    %c0 = arith.constant 0 : index
    %c0_0 = arith.constant 0 : index
    %0 = vector.load %arg1[%c0, %c0_0] : memref<16x32xf32, #tpu.memory_space<vmem>>, vector<16x32xf32>
    %1 = arith.truncf %0 : vector<16x32xf32> to vector<16x32xbf16>
    %c0_1 = arith.constant 0 : index
    %c0_2 = arith.constant 0 : index
    %2 = vector.load %arg2[%c0_1, %c0_2] : memref<32x128xbf16, #tpu.memory_space<vmem>>, vector<32x128xbf16>
    %cst = arith.constant dense<0.000000e+00> : vector<16x128xf32>
    %3 = tpu.matmul %1, %2, %cst {dimension_numbers = #tpu.dot_dimension_numbers<[1], [0], [0], [1], [0, 0, 1, 1], [], []>} : vector<16x32xbf16>, vector<32x128xbf16>, vector<16x128xf32> -> vector<16x128xf32>
    %c0_3 = arith.constant 0 : index
    %c0_4 = arith.constant 0 : index
    %4 = vector.load %arg3[%c0_3, %c0_4] : memref<1x128xf32, #tpu.memory_space<vmem>>, vector<1x128xf32>
    %5 = vector.broadcast %4 : vector<1x128xf32> to vector<16x128xf32>
    %6 = arith.addf %3, %5 : vector<16x128xf32>
    %cst_5 = arith.constant 0.000000e+00 : f32
    %7 = vector.broadcast %cst_5 : f32 to vector<16x128xf32>
    %8 = arith.maximumf %6, %7 : vector<16x128xf32>
    %9 = arith.truncf %8 : vector<16x128xf32> to vector<16x128xbf16>
    %c0_6 = arith.constant 0 : index
    %c0_7 = arith.constant 0 : index
    %10 = vector.load %arg4[%c0_6, %c0_7] : memref<128x32xbf16, #tpu.memory_space<vmem>>, vector<128x32xbf16>
    %cst_8 = arith.constant dense<0.000000e+00> : vector<16x32xf32>
    %11 = tpu.matmul %9, %10, %cst_8 {dimension_numbers = #tpu.dot_dimension_numbers<[1], [0], [0], [1], [0, 0, 1, 1], [], []>} : vector<16x128xbf16>, vector<128x32xbf16>, vector<16x32xf32> -> vector<16x32xf32>
    %c0_9 = arith.constant 0 : index
    %c0_10 = arith.constant 0 : index
    %12 = vector.load %arg5[%c0_9, %c0_10] : memref<1x32xf32, #tpu.memory_space<vmem>>, vector<1x32xf32>
    %13 = vector.broadcast %12 : vector<1x32xf32> to vector<16x32xf32>
    %14 = arith.addf %11, %13 : vector<16x32xf32>
    %15 = arith.addf %0, %14 : vector<16x32xf32>
    %c0_11 = arith.constant 0 : index
    %c0_12 = arith.constant 0 : index
    %16 = vector.load %arg6[%c0_11, %c0_12] : memref<1x32xf32, #tpu.memory_space<vmem>>, vector<1x32xf32>
    %c0_13 = arith.constant 0 : index
    %c0_14 = arith.constant 0 : index
    %17 = vector.load %arg7[%c0_13, %c0_14] : memref<1x32xf32, #tpu.memory_space<vmem>>, vector<1x32xf32>
    %cst_15 = arith.constant dense<0.000000e+00> : vector<16xf32>
    %18 = vector.multi_reduction <add>, %15, %cst_15 [1] : vector<16x32xf32> to vector<16xf32>
    %19 = vector.shape_cast %18 : vector<16xf32> to vector<16x1xf32>
    %cst_16 = arith.constant 3.200000e+01 : f32
    %20 = vector.broadcast %cst_16 : f32 to vector<16x1xf32>
    %21 = arith.divf %19, %20 : vector<16x1xf32>
    %22 = vector.broadcast %21 : vector<16x1xf32> to vector<16x32xf32>
    %23 = arith.subf %15, %22 : vector<16x32xf32>
    %24 = arith.mulf %23, %23 : vector<16x32xf32>
    %cst_17 = arith.constant dense<0.000000e+00> : vector<16xf32>
    %25 = vector.multi_reduction <add>, %24, %cst_17 [1] : vector<16x32xf32> to vector<16xf32>
    %26 = vector.shape_cast %25 : vector<16xf32> to vector<16x1xf32>
    %cst_18 = arith.constant 3.200000e+01 : f32
    %27 = vector.broadcast %cst_18 : f32 to vector<16x1xf32>
    %28 = arith.divf %26, %27 : vector<16x1xf32>
    %29 = vector.broadcast %21 : vector<16x1xf32> to vector<16x32xf32>
    %30 = arith.subf %15, %29 : vector<16x32xf32>
    %cst_19 = arith.constant 9.99999974E-6 : f32
    %31 = vector.broadcast %cst_19 : f32 to vector<16x1xf32>
    %32 = arith.addf %28, %31 : vector<16x1xf32>
    %33 = math.rsqrt %32 : vector<16x1xf32>
    %34 = vector.broadcast %33 : vector<16x1xf32> to vector<16x32xf32>
    %35 = arith.mulf %30, %34 : vector<16x32xf32>
    %36 = vector.broadcast %16 : vector<1x32xf32> to vector<16x32xf32>
    %37 = arith.mulf %35, %36 : vector<16x32xf32>
    %38 = vector.broadcast %17 : vector<1x32xf32> to vector<16x32xf32>
    %39 = arith.addf %37, %38 : vector<16x32xf32>
    %c0_20 = arith.constant 0 : index
    %c0_21 = arith.constant 0 : index
    %40 = vector.load %arg8[%c0_20, %c0_21] : memref<16x32xf32, #tpu.memory_space<vmem>>, vector<16x32xf32>
    tpu.vector_store %arg8[%c0_20, %c0_21], %39 {strides = array<i32>} : memref<16x32xf32, #tpu.memory_space<vmem>>, vector<16x32xf32>,
    return
  }
  func.func @transform_0(%arg0: i32) -> (i32, i32) {
    %c0_i32 = arith.constant 0 : i32
    %c0_i32_0 = arith.constant 0 : i32
    return %arg0, %c0_i32 : i32, i32
  }
  func.func @transform_1(%arg0: i32) -> (i32, i32) {
    %c0_i32 = arith.constant 0 : i32
    %c0_i32_0 = arith.constant 0 : i32
    %c0_i32_1 = arith.constant 0 : i32
    return %c0_i32, %c0_i32_0 : i32, i32
  }
  func.func @transform_2(%arg0: i32) -> (i32, i32) {
    %c0_i32 = arith.constant 0 : i32
    %c0_i32_0 = arith.constant 0 : i32
    %c0_i32_1 = arith.constant 0 : i32
    return %c0_i32, %c0_i32_0 : i32, i32
  }
  func.func @transform_3(%arg0: i32) -> (i32, i32) {
    %c0_i32 = arith.constant 0 : i32
    %c0_i32_0 = arith.constant 0 : i32
    %c0_i32_1 = arith.constant 0 : i32
    return %c0_i32, %c0_i32_0 : i32, i32
  }
  func.func @transform_4(%arg0: i32) -> (i32, i32) {
    %c0_i32 = arith.constant 0 : i32
    %c0_i32_0 = arith.constant 0 : i32
    %c0_i32_1 = arith.constant 0 : i32
    return %c0_i32, %c0_i32_0 : i32, i32
  }
  func.func @transform_5(%arg0: i32) -> (i32, i32) {
    %c0_i32 = arith.constant 0 : i32
    %c0_i32_0 = arith.constant 0 : i32
    %c0_i32_1 = arith.constant 0 : i32
    return %c0_i32, %c0_i32_0 : i32, i32
  }
  func.func @transform_6(%arg0: i32) -> (i32, i32) {
    %c0_i32 = arith.constant 0 : i32
    %c0_i32_0 = arith.constant 0 : i32
    %c0_i32_1 = arith.constant 0 : i32
    return %c0_i32, %c0_i32_0 : i32, i32
  }
  func.func @transform_7(%arg0: i32) -> (i32, i32) {
    %c0_i32 = arith.constant 0 : i32
    %c0_i32_0 = arith.constant 0 : i32
    return %arg0, %c0_i32 : i32, i32
  }
}

module attributes {stable_mosaic.version = 11 : i64} {
  func.func @_linear_kernel(%arg0: i32, %arg1: i32, %arg2: i32, %arg3: memref<16x32xf32, #tpu.memory_space<vmem>>, %arg4: memref<32x50xbf16, #tpu.memory_space<vmem>>, %arg5: memref<1x50xf32, #tpu.memory_space<vmem>>, %arg6: memref<16x50xf32, #tpu.memory_space<vmem>>, %arg7: memref<16x50xf32, #tpu.memory_space<vmem>>) attributes {dimension_semantics = [#tpu.dimension_semantics<parallel>, #tpu.dimension_semantics<parallel>, #tpu.dimension_semantics<arbitrary>], iteration_bounds = array<i64: 1, 1, 1>, scalar_prefetch = 0 : i64, scratch_operands = 1 : i64, tpu.core_type = #tpu.core_type<tc>, window_params = [{transform_indices = @transform_0, window_bounds = array<i64: 16, 32>}, {transform_indices = @transform_1, window_bounds = array<i64: 32, 50>}, {transform_indices = @transform_2, window_bounds = array<i64: 1, 50>}, {transform_indices = @transform_3, window_bounds = array<i64: 16, 50>}]} {
    %c0_i32 = arith.constant 0 : i32
    %0 = arith.cmpi eq, %arg2, %c0_i32 : i32
    %1 = arith.extui %0 : i1 to i32
    %c0_i32_0 = arith.constant 0 : i32
    %2 = arith.cmpi ne, %1, %c0_i32_0 : i32
    scf.if %2 {
      %cst_10 = arith.constant 0.000000e+00 : f32
      %13 = vector.broadcast %cst_10 : f32 to vector<16x50xf32>
      %c0_11 = arith.constant 0 : index
      %c0_12 = arith.constant 0 : index
      %14 = vector.load %arg7[%c0_11, %c0_12] : memref<16x50xf32, #tpu.memory_space<vmem>>, vector<16x50xf32>
      tpu.vector_store %arg7[%c0_11, %c0_12], %13 {strides = array<i32>} : memref<16x50xf32, #tpu.memory_space<vmem>>, vector<16x50xf32>,
    } else {
    }
    %c0 = arith.constant 0 : index
    %c0_1 = arith.constant 0 : index
    %3 = vector.load %arg7[%c0, %c0_1] : memref<16x50xf32, #tpu.memory_space<vmem>>, vector<16x50xf32>
    %c0_2 = arith.constant 0 : index
    %c0_3 = arith.constant 0 : index
    %4 = vector.load %arg3[%c0_2, %c0_3] : memref<16x32xf32, #tpu.memory_space<vmem>>, vector<16x32xf32>
    %5 = arith.truncf %4 : vector<16x32xf32> to vector<16x32xbf16>
    %c0_4 = arith.constant 0 : index
    %c0_5 = arith.constant 0 : index
    %6 = vector.load %arg4[%c0_4, %c0_5] : memref<32x50xbf16, #tpu.memory_space<vmem>>, vector<32x50xbf16>
    %cst = arith.constant dense<0.000000e+00> : vector<16x50xf32>
    %7 = tpu.matmul %5, %6, %cst {dimension_numbers = #tpu.dot_dimension_numbers<[1], [0], [0], [1], [0, 0, 1, 1], [], []>} : vector<16x32xbf16>, vector<32x50xbf16>, vector<16x50xf32> -> vector<16x50xf32>
    %8 = arith.addf %3, %7 : vector<16x50xf32>
    %c0_6 = arith.constant 0 : index
    %c0_7 = arith.constant 0 : index
    %9 = vector.load %arg7[%c0_6, %c0_7] : memref<16x50xf32, #tpu.memory_space<vmem>>, vector<16x50xf32>
    tpu.vector_store %arg7[%c0_6, %c0_7], %8 {strides = array<i32>} : memref<16x50xf32, #tpu.memory_space<vmem>>, vector<16x50xf32>,
    %c0_i32_8 = arith.constant 0 : i32
    %10 = arith.cmpi eq, %arg2, %c0_i32_8 : i32
    %11 = arith.extui %10 : i1 to i32
    %c0_i32_9 = arith.constant 0 : i32
    %12 = arith.cmpi ne, %11, %c0_i32_9 : i32
    scf.if %12 {
      %c0_10 = arith.constant 0 : index
      %c0_11 = arith.constant 0 : index
      %13 = vector.load %arg7[%c0_10, %c0_11] : memref<16x50xf32, #tpu.memory_space<vmem>>, vector<16x50xf32>
      %c0_12 = arith.constant 0 : index
      %c0_13 = arith.constant 0 : index
      %14 = vector.load %arg5[%c0_12, %c0_13] : memref<1x50xf32, #tpu.memory_space<vmem>>, vector<1x50xf32>
      %15 = vector.broadcast %14 : vector<1x50xf32> to vector<16x50xf32>
      %16 = arith.addf %13, %15 : vector<16x50xf32>
      %c0_14 = arith.constant 0 : index
      %c0_15 = arith.constant 0 : index
      %17 = vector.load %arg6[%c0_14, %c0_15] : memref<16x50xf32, #tpu.memory_space<vmem>>, vector<16x50xf32>
      tpu.vector_store %arg6[%c0_14, %c0_15], %16 {strides = array<i32>} : memref<16x50xf32, #tpu.memory_space<vmem>>, vector<16x50xf32>,
    } else {
    }
    return
  }
  func.func @transform_0(%arg0: i32, %arg1: i32, %arg2: i32) -> (i32, i32) {
    %c0_i32 = arith.constant 0 : i32
    return %arg0, %arg2 : i32, i32
  }
  func.func @transform_1(%arg0: i32, %arg1: i32, %arg2: i32) -> (i32, i32) {
    %c0_i32 = arith.constant 0 : i32
    return %arg2, %arg1 : i32, i32
  }
  func.func @transform_2(%arg0: i32, %arg1: i32, %arg2: i32) -> (i32, i32) {
    %c0_i32 = arith.constant 0 : i32
    %c0_i32_0 = arith.constant 0 : i32
    return %c0_i32, %arg1 : i32, i32
  }
  func.func @transform_3(%arg0: i32, %arg1: i32, %arg2: i32) -> (i32, i32) {
    %c0_i32 = arith.constant 0 : i32
    return %arg0, %arg1 : i32, i32
  }
}

</mosaic_0001>

<bundles_post_ra>
// kernel: run.8
= control target key start
LH: loop header
LB: loop body
LE: loop exit
PB: predicated region body
PF: predicated region fallthrough
CT: control target
= control target key end

     0   :  { %vm54_vm0 = vcmask 392192   ;;  %vm91_vm1 = vcmask 257024   ;;  %vm84_vm2 = vcmask 261120   ;;  %v210_v22 = vmov 32.0   ;;  %s286_s1 = inlined_call_operand.vmem [shape: bf16[48,32], index: 1, kind: input, shape index: {}]   ;;  %s287_s2 = inlined_call_operand.vmem [shape: f32[1,32], index: 2, kind: input, shape index: {}]   ;;  %s288_s0 = inlined_call_operand.vmem [shape: f32[20,48], index: 0, kind: input, shape index: {}]   ;;  %s289_s3 = inlined_call_operand.vmem [shape: f32[1,32], index: 3, kind: input, shape index: {}]   ;;  %s290_s4 = inlined_call_operand.vmem [shape: f32[1,32], index: 4, kind: input, shape index: {}]   ;;  %s291_s5 = inlined_call_operand.vmem [shape: f32[20,32], index: 5, kind: output, shape index: {}]  }
   0x1   :  { %v194_v0 = vld [vmem:[%s286_s1 + $0x10] sm:$0xff]  ;;  %v193_v1 = vld [vmem:[%s286_s1 + $0x8] sm:$0xff]  ;;  %v192_v2 = vld [vmem:[%s286_s1] sm:$0xff]  ;;  %202 = vrcp.f32 %v210_v22 }
   0x2   :  { %66 = vmatpush.bf16.msra.mxu0 %v194_v0  ;;  %195 = vmatpush.bf16.msra.mxu1 %v194_v0  ;;  %v21_v3 = vld [vmem:[%s288_s0] sm:$0xff]  ;;  %v22_v4 = vld [vmem:[%s288_s0 + $0x8] sm:$0xff]  ;;  %v23_v5 = vld [vmem:[%s288_s0 + $0x10] sm:$0xf] }
   0x3   :  { %v24_v6 = vpack.c.bf16 %v22_v4, %v21_v3  ;;  %v25_v7 = vpack.c.bf16 %v23_v5, %v23_v5  ;;  %v199_v8 = vld [vmem:[%s287_s2] ss:$0 sm:$0xff] }
   0x4   :  { %v200_v61 = vld [vmem:[%s289_s3] ss:$0 sm:$0xff] }
   0x5   :  { %v201_v0 = vld [vmem:[%s290_s4] ss:$0 sm:$0xff] }
   0x6   :  { %67 = vmatpush.bf16.msra.mxu0 %v193_v1  ;;  %196 = vmatpush.bf16.msra.mxu1 %v193_v1 }
   0x7   :  { %v203_v23 = vpop.eup %202 }
   0x8   :  { %v96_v24 = vmul.f32 32.0, %v203_v23  ;;  %vm100_vm3 = vweird.f32 %v203_v23 }
   0xa   :  { %68 = vmatpush.bf16.msra.mxu0 %v192_v2  ;;  %197 = vmatpush.bf16.msra.mxu1 %v192_v2  ;;  %v97_v25 = vsub.f32 1.0, %v96_v24 }
   0xc   :  { %v98_v26 = vmul.f32 %v203_v23, %v97_v25 }
   0xd   :  { %190 = vmatmul.msk.bf16.vlgmr.msra.gmra.mxu0 %vm54_vm0, %v24_v6  ;;  %191 = vmatmul.msk.bf16.vlgmr.msra.gmra.mxu1 %vm54_vm0, %v25_v7 }
   0xe   :  { %v99_v27 = vadd.f32 %v203_v23, %v98_v26 }
  0x10   :  { %v101_v28 = vsel %vm100_vm3, %v203_v23, %v99_v27 }
  0x8a   :  { %v70_v9 = vpop.f32.mrf.mxu0  ;;  %v75_v10 = vpop.f32.mrf.mxu1 }
  0x8b   :  { %v71_v11 = vadd.f32 %v199_v8, %v70_v9  ;;  %v76_v12 = vadd.f32 %v199_v8, %v75_v10 }
  0x8d   :  { %v79_v13 = vmax.f32 %v71_v11, 0.0  ;;  %v81_v14 = vmax.f32 %v76_v12, 0.0 }
  0x8f   :  { %v92_v15 = vsel %vm91_vm1, %v81_v14, 0.0  ;;  %v85_v16 = vsel %vm84_vm2, %v79_v13, 0.0 }
  0x90   :  { %93 = vadd.xlane.f32.xlu1 %v92_v15  ;;  %86 = vadd.xlane.f32.xlu0 %v85_v16 }
  0x92   :  { %v72_v17 = vpop.f32.mrf.mxu0  ;;  %v77_v18 = vpop.f32.mrf.mxu1 }
  0x93   :  { %v73_v19 = vadd.f32 %v199_v8, %v72_v17 }
  0x95   :  { %v80_v20 = vmax.f32 %v73_v19, 0.0 }
  0x97   :  { %v88_v21 = vsel %vm84_vm2, %v80_v20, 0.0 }
  0x98   :  { %89 = vadd.xlane.f32.xlu0 %v88_v21 }
 0x103   :  { %v87_v29 = vpop.xlane.xlu0 %86  ;;  %v94_v34 = vpop.xlane.xlu1 %93 }
 0x104   :  { %v102_v30 = vmul.f32 %v101_v28, %v87_v29  ;;  %v104_v37 = vmul.f32 %v101_v28, %v94_v34 }
 0x106   :  { %v105_v31 = vsub.f32 %v79_v13, %v102_v30  ;;  %v107_v40 = vsub.f32 %v81_v14, %v104_v37 }
 0x108   :  { %v108_v32 = vmul.f32 %v105_v31, %v105_v31  ;;  %v110_v42 = vmul.f32 %v107_v40, %v107_v40 }
 0x10a   :  { %v111_v33 = vsel %vm84_vm2, %v108_v32, 0.0  ;;  %v117_v43 = vsel %vm91_vm1, %v110_v42, 0.0 }
 0x10b   :  { %112 = vadd.xlane.f32.xlu1 %v111_v33  ;;  %v90_v35 = vpop.xlane.xlu0 %89 }
 0x10c   :  { %v103_v36 = vmul.f32 %v101_v28, %v90_v35 }
 0x10e   :  { %v106_v38 = vsub.f32 %v80_v20, %v103_v36 }
 0x110   :  { %v109_v39 = vmul.f32 %v106_v38, %v106_v38 }
 0x112   :  { %v114_v41 = vsel %vm84_vm2, %v109_v39, 0.0 }
 0x113   :  { %115 = vadd.xlane.f32.xlu2 %v114_v41 }
 0x11b   :  { %118 = vadd.xlane.f32.xlu2 %v117_v43 }
 0x17e   :  { %v113_v44 = vpop.xlane.xlu1 %112 }
 0x17f   :  { %v120_v45 = vmul.f32 %v113_v44, %v101_v28 }
 0x181   :  { %v123_v46 = vadd.f32 1e-05, %v120_v45 }
 0x183   :  { %204 = vrsqrt.f32 %v123_v46  ;;  %vm132_vm5 = vweird.f32 %v123_v46 }
 0x186   :  { %v116_v47 = vpop.xlane.xlu2 %115 }
 0x187   :  { %v121_v48 = vmul.f32 %v116_v47, %v101_v28 }
 0x189   :  { %v205_v49 = vpop.eup %204  ;;  %v124_v50 = vadd.f32 1e-05, %v121_v48 }
 0x18a   :  { %v127_v51 = vmul.f32 %v205_v49, %v123_v46  ;;  %vm133_vm4 = vweird.f32 %v205_v49 }
 0x18b   :  { %206 = vrsqrt.f32 %v124_v50  ;;  %vm134_vm6 = vmor %vm132_vm5, %vm133_vm4  ;;  %vm142_vm8 = vweird.f32 %v124_v50 }
 0x18c   :  { %v128_v52 = vmul.f32 %v205_v49, %v127_v51 }
 0x18e   :  { %v129_v53 = vmul.f32 0.5, %v128_v52  ;;  %v119_v54 = vpop.xlane.xlu2 %118 }
 0x18f   :  { %v122_v55 = vmul.f32 %v119_v54, %v101_v28 }
 0x190   :  { %v130_v56 = vsub.f32 1.5, %v129_v53 }
 0x191   :  { %v207_v57 = vpop.eup %206  ;;  %v125_v58 = vadd.f32 1e-05, %v122_v55 }
 0x192   :  { %v131_v59 = vmul.f32 %v205_v49, %v130_v56  ;;  %v137_v60 = vmul.f32 %v207_v57, %v124_v50  ;;  %vm143_vm7 = vweird.f32 %v207_v57 }
 0x193   :  { %208 = vrsqrt.f32 %v125_v58  ;;  %vm144_vm9 = vmor %vm142_vm8, %vm143_vm7  ;;  %vm152_vm11 = vweird.f32 %v125_v58 }
 0x194   :  { %v135_v62 = vsel %vm134_vm6, %v205_v49, %v131_v59  ;;  %v138_v63 = vmul.f32 %v207_v57, %v137_v60 }
 0x195   :  { %v156_v1 = vmul.f32 %v135_v62, %v105_v31 }
 0x196   :  { %v139_v2 = vmul.f32 0.5, %v138_v63 }
 0x197   :  { %v162_v3 = vmul.f32 %v200_v61, %v156_v1 }
 0x198   :  { %v140_v4 = vsub.f32 1.5, %v139_v2 }
 0x199   :  { %v209_v5 = vpop.eup %208  ;;  %v168_v6 = vadd.f32 %v201_v0, %v162_v3 }
 0x19a   :  { %v141_v7 = vmul.f32 %v207_v57, %v140_v4  ;;  %v147_v8 = vmul.f32 %v209_v5, %v125_v58  ;;  %vm153_vm10 = vweird.f32 %v209_v5 }
 0x19b   :  { %171 = vst.msk [vmem:[%s291_s5] sm:$0xff] %vm84_vm2, %v168_v6  ;;  %vm154_vm12 = vmor %vm152_vm11, %vm153_vm10 }
 0x19c   :  { %v145_v9 = vsel %vm144_vm9, %v207_v57, %v141_v7  ;;  %v148_v10 = vmul.f32 %v209_v5, %v147_v8 }
 0x19d   :  { %v157_v11 = vmul.f32 %v145_v9, %v106_v38 }
 0x19e   :  { %v149_v12 = vmul.f32 0.5, %v148_v10 }
 0x19f   :  { %v163_v13 = vmul.f32 %v200_v61, %v157_v11 }
 0x1a0   :  { %v150_v14 = vsub.f32 1.5, %v149_v12 }
 0x1a1   :  { %v169_v15 = vadd.f32 %v201_v0, %v163_v13 }
 0x1a2   :  { %v151_v16 = vmul.f32 %v209_v5, %v150_v14 }
 0x1a3   :  { %172 = vst.msk [vmem:[%s291_s5 + $0x8] sm:$0xff] %vm84_vm2, %v169_v15 }
 0x1a4   :  { %v155_v17 = vsel %vm154_vm12, %v209_v5, %v151_v16 }
 0x1a5   :  { %v158_v18 = vmul.f32 %v155_v17, %v107_v40 }
 0x1a7   :  { %v164_v19 = vmul.f32 %v200_v61, %v158_v18 }
 0x1a9   :  { %v170_v20 = vadd.f32 %v201_v0, %v164_v19 }
 0x1ab   :  { %173 = vst.msk [vmem:[%s291_s5 + $0x10] sm:$0xf] %vm91_vm1, %v170_v20 }

// kernel: run.9
= control target key start
LH: loop header
LB: loop body
LE: loop exit
PB: predicated region body
PF: predicated region fallthrough
CT: control target
= control target key end

     0   :  { %s1100_s17 = smov 0   ;;  %s1225_s0 = inlined_call_operand.vmem [shape: f32[2,8,32], index: 0, kind: input, shape index: {}, may-alias: {0,1}]   ;;  %s1226_s1 = inlined_call_operand.vmem [shape: f32[2,8,32], index: 1, kind: input, shape index: {}, may-alias: {0,1}]   ;;  %s1227_s2 = inlined_call_operand.vmem [shape: f32[2,8,8], index: 2, kind: input, shape index: {}]   ;;  %s1228_s3 = inlined_call_operand.vmem [shape: bf16[32,32], index: 3, kind: input, shape index: {}]   ;;  %s1229_s4 = inlined_call_operand.vmem [shape: f32[1,32], index: 4, kind: input, shape index: {}]   ;;  %s1230_s5 = inlined_call_operand.vmem [shape: bf16[32,64], index: 5, kind: input, shape index: {}]   ;;  %s1231_s6 = inlined_call_operand.vmem [shape: f32[1,64], index: 6, kind: input, shape index: {}]   ;;  %s1232_s7 = inlined_call_operand.vmem [shape: bf16[32,32], index: 7, kind: input, shape index: {}]   ;;  %s1233_s8 = inlined_call_operand.vmem [shape: f32[1,32], index: 8, kind: input, shape index: {}]   ;;  %s1234_s9 = inlined_call_operand.vmem [shape: f32[1,32], index: 9, kind: input, shape index: {}]   ;;  %s1235_s10 = inlined_call_operand.vmem [shape: f32[1,32], index: 10, kind: input, shape index: {}]   ;;  %s1236_s11 = inlined_call_operand.vmem [shape: f32[2,8,32], index: 11, kind: output, shape index: {}]  }
   0x1 LB: > { %s938_s18 = sadd.s32 4294967295, %s1030_s17   ;;  %p942_p0 = scmp.ge.s32.totalorder %s1030_s17, 1  ;;  %s1030_s17 = sphi %s1100_s17, %s21_s17  }
   0x2   : > { %p354_p1 = scmp.lt.s32.totalorder %s1030_s17, 3 }
   0x4   : > { %p355_p2 = pnand %p942_p0, %p354_p1 }
   0x5   : > { %p400_p3 = scmp.lt.s32.totalorder (!%p355_p2), %s938_s18, 1  ;;  %s1032_s20 = smov (!%p355_p2), 120  }
   0x6   : > { %358 = sbr.rel (%p355_p2) target bundleno = 1628 (0x65c), region = 64  ;;  %s1033_s21 = smov (!%p355_p2), 96  }
   0x7   : > { %s1034_s22 = smov (!%p355_p2), 104   ;;  %s1035_s23 = smov (!%p355_p2), 112  }
   0x8   : > { %s1037_s12 = smov (!%p355_p2), 80   ;;  %s1038_s13 = smov (!%p355_p2), 72  }
   0xb   : > { %v980_v0 = vld [vmem:[%s1228_s3 + $0x8] sm:$0xff]  ;;  %v979_v2 = vld [vmem:[%s1228_s3] sm:$0xff]  ;;  %s1238_s18 = smov (!%p400_p3, %s938_s18), 1  ;;  %vm442_vm0 = vcmask 261120   ;;  %vm497_vm1 = vcmask 64512   ;;  %vm537_vm2 = vcmask 1043456  }
   0xc   : > { %v982_v1 = vld [vmem:[%s1230_s5 + $0x8] sm:$0xff]  ;;  %452 = vmatpush.bf16.msra.mxu0 %v980_v0  ;;  %v981_v3 = vld [vmem:[%s1230_s5] sm:$0xff]  ;;  %s1120_s27 = sshll.u32 %s1238_s18, 3 }
   0xd   : > { %488 = vmatpush.bf16.msra.mxu1 %v982_v1  ;;  %s403_s30 = scalar_lea.vmem %s1225_s0, %s1120_s27  ;;  %s407_s14 = scalar_lea.vmem %s1226_s1, %s1120_s27  ;;  %v999_v8 = vld [vmem:[%s1229_s4] ss:$0 sm:$0xff] }
   0xe   : > { %v1126_v4 = vld [vmem:[%s403_s30] sm:$0xff]  ;;  %s411_s29 = scalar_lea.vmem %s1227_s2, %s1120_s27  ;;  %s1036_s30 = smov 88  }
   0xf   : > { %v420_v5 = vpack.c.bf16 %v1126_v4, %v1126_v4  ;;  %v418_v6 = vld [vmem:[%s407_s14] sm:$0xff] }
  0x10   : > { %453 = vmatpush.bf16.msra.mxu0 %v979_v2  ;;  %v421_v7 = vpack.c.bf16 %v418_v6, %v418_v6  ;;  %v1000_v9 = vld [vmem:[%s1231_s6] ss:$0 sm:$0xff] }
  0x11   : > { %489 = vmatpush.bf16.msra.mxu1 %v981_v3  ;;  %v555_v19 = vld [vmem:[%s1232_s7] sm:$0xf] }
  0x12   : > { %v640_v20 = vsel %vm537_vm2, %v555_v19, 0  ;;  %v419_v29 = vld [vmem:[%s411_s29] sm:$0xff] }
  0x13   : > { %955 = vmatmul.msk.bf16.vlgmr.msra.gmra.mxu0 %vm442_vm0, %v420_v5 }
  0x14   : > { %964 = vmatmul.msk.bf16.vlgmr.msra.gmra.mxu1 %vm442_vm0, %v421_v7 }
  0x90   : > { %v455_v10 = vpop.f32.mrf.mxu0 }
  0x91   : > { %v456_v11 = vadd.f32 %v999_v8, %v455_v10  ;;  %v491_v12 = vpop.f32.mrf.mxu1 }
  0x92   : > { %v492_v13 = vadd.f32 %v1000_v9, %v491_v12 }
  0x93   : > { %v495_v14 = vpack.c.bf16 %v456_v11, %v456_v11 }
  0x94   : > { %v1142_v15 = vpack.c.bf16 %v492_v13, %v492_v13 }
  0x95   : > { %557 = vrot.lane.b32.xlu2 %v495_v14, %s1032_s20 }
  0x96   : > { %532 = vrot.lane.b32.xlu1 %v1142_v15, %s1033_s21  ;;  %v502_v16 = vsel %vm497_vm1, %v1142_v15, 0 }
  0x97   : > { %511 = vmatpush.bf16.xpose.msra.mxu2 %v502_v16 }
  0x98   : > { %v457_v17 = vpop.f32.mrf.mxu0 }
  0x99   : > { %v493_v18 = vpop.f32.mrf.mxu1 }
  0x9d   : > { %737 = vrot.lane.b32.xlu2 %v1142_v15, %s1034_s22 }
  0x9e   : > { %559 = vrot.lane.b32.xlu1 %v1142_v15, %s1032_s20  ;;  %965 = vmatmul.msk.bf16.vlgmr.msra.gmra.mxu2 %vm497_vm1, %v495_v14 }
  0x9f   : > { %649 = vmatpush.bf16.msrb.mxu2 %v640_v20 }
  0xa5   : > { %655 = vrot.lane.b32.xlu2 %v495_v14, %s1035_s23 }
  0xa6   : > { %735 = vrot.lane.b32.xlu1 %v495_v14, %s1034_s22 }
  0xef   : > { %v558_v21 = vpop.permute.xlu2 %557 }
  0xf7   : > { %v738_v22 = vpop.permute.xlu2 %737 }
  0xf8   : > { %v743_v23 = vsel %vm497_vm1, %v738_v22, 0 }
  0xf9   : > { %752 = vmatpush.bf16.xpose.msra.mxu2 %v743_v23 }
  0xff   : > { %v656_v45 = vpop.permute.xlu2 %655 }
 0x108   : > { %v533_v24 = vpop.permute.xlu1 %532 }
 0x109   : > { %v539_v25 = vsel %vm537_vm2, %v533_v24, 0 }
 0x10a   : > { %548 = vmatpush.bf16.msra.mxu3 %v539_v25 }
 0x110   : > { %v560_v26 = vpop.permute.xlu1 %559 }
 0x111   : > { %v565_v27 = vsel %vm497_vm1, %v560_v26, 0 }
 0x112   : > { %574 = vmatpush.bf16.xpose.msrb.mxu3 %v565_v27 }
 0x118   : > { %v736_v51 = vpop.permute.xlu1 %735 }
 0x121   : > { %v513_v28 = vpop.f32.mrf.mxu2 }
 0x122   : > { %v517_v30 = vmul.f32 0.35355338, %v513_v28 }
 0x124   : > { %v518_v31 = vadd.f32 %v517_v30, %v419_v29 }
 0x126   : > { %v519_v32 = vsel %vm497_vm1, %v518_v31, -inf }
 0x127   : > { %520 = vmax.xlane.f32.xlu0 %v519_v32  ;;  %v616_v32 = vld [vmem:[%s1232_s7 + $0x4] sm:$0xf] }
 0x129   : > { %v515_v33 = vpop.f32.mrf.mxu2 }
 0x12a   : > { %v621_v33 = vsel %vm537_vm2, %v616_v32, 0 }
 0x12b   : > { %630 = vmatpush.bf16.msrb.mxu1 %v621_v33 }
 0x19a   : > { %v521_v34 = vpop.xlane.xlu0 %520 }
 0x19b   : > { %v522_v35 = vsub.f32 %v518_v31, %v521_v34  ;;  %v714_v34 = vld [vmem:[%s1232_s7 + $0x8] sm:$0xf] }
 0x19d   : > { %v523_v36 = vmul.f32 1.442695, %v522_v35 }
 0x19f   : > { %1004 = vpow2.f32 %v523_v36  ;;  %v719_v36 = vsel %vm537_vm2, %v714_v34, 0 }
 0x1a0   : > { %728 = vmatpush.bf16.msra.mxu1 %v719_v36 }
 0x1a5   : > { %v1005_v37 = vpop.eup %1004 }
 0x1a6   : > { %v525_v38 = vsel %vm497_vm1, %v1005_v37, 0.0 }
 0x1a7   : > { %526 = vadd.xlane.f32.xlu0 %v525_v38 }
 0x1bb   : > { %657 = vrot.lane.b32.xlu0 %v1142_v15, %s1035_s23 }
 0x21a   : > { %v527_v39 = vpop.xlane.xlu0 %526 }
 0x21b   : > { %1006 = vrcp.f32 %v527_v39 }
 0x221   : > { %v1007_v40 = vpop.eup %1006 }
 0x222   : > { %v529_v41 = vmul.f32 %v1007_v40, %v1005_v37 }
 0x224   : > { %v530_v42 = vpack.c.bf16 %v529_v41, %v529_v41 }
 0x226   : > { %966 = vmatmul.msk.bf16.vlgmr.msra.gmra.mxu3 %vm497_vm1, %v530_v42 }
 0x22d   : > { %v658_v43 = vpop.permute.xlu0 %657 }
 0x22e   : > { %v663_v44 = vsel %vm497_vm1, %v658_v43, 0 }
 0x22f   : > { %672 = vmatpush.bf16.xpose.msra.mxu3 %v663_v44 }
 0x236   : > { %967 = vmatmul.msk.bf16.vlgmr.msrb.gmra.mxu3 %vm497_vm1, %v558_v21 }
 0x246   : > { %971 = vmatmul.msk.bf16.vlgmr.msra.gmra.mxu3 %vm497_vm1, %v656_v45 }
 0x2a9   : > { %v550_v46 = vpop.f32.mrf.mxu3 }
 0x2aa   : > { %v554_v47 = vpack.c.bf16 %v550_v46, %v550_v46 }
 0x2ac   : > { %970 = vmatmul.msk.bf16.vlgmr.msrb.gmra.mxu2 %vm497_vm1, %v554_v47  ;;  %v794_v47 = vld [vmem:[%s1232_s7 + $0xc] sm:$0xf] }
 0x2b1   : > { %v552_v48 = vpop.f32.mrf.mxu3 }
 0x2b2   : > { %v799_v48 = vsel %vm537_vm2, %v794_v47, 0 }
 0x2b9   : > { %v576_v49 = vpop.f32.mrf.mxu3 }
 0x2ba   : > { %v580_v50 = vmul.f32 0.35355338, %v576_v49 }
 0x2bc   : > { %974 = vmatmul.msk.bf16.vlgmr.msra.gmra.mxu2 %vm497_vm1, %v736_v51  ;;  %v581_v52 = vadd.f32 %v580_v50, %v419_v29 }
 0x2be   : > { %v582_v53 = vsel %vm497_vm1, %v581_v52, -inf }
 0x2bf   : > { %583 = vmax.xlane.f32.xlu1 %v582_v53 }
 0x2c1   : > { %v578_v54 = vpop.f32.mrf.mxu3 }
 0x2c9   : > { %v674_v55 = vpop.f32.mrf.mxu3 }
 0x2ca   : > { %v678_v56 = vmul.f32 0.35355338, %v674_v55 }
 0x2cc   : > { %v679_v57 = vadd.f32 %v678_v56, %v419_v29 }
 0x2ce   : > { %v680_v58 = vsel %vm497_vm1, %v679_v57, -inf }
 0x2cf   : > { %681 = vmax.xlane.f32.xlu0 %v680_v58 }
 0x2d1   : > { %v676_v59 = vpop.f32.mrf.mxu3 }
 0x2d8   : > { %594 = vrot.lane.b32.xlu1 %v1142_v15, %s1036_s30  ;;  %s415_s30 = scalar_lea.vmem %s1236_s11, %s1120_s27 }
 0x32f   : > { %v1175_v60 = vpop.f32.mrf.mxu2 }
 0x332   : > { %v584_v62 = vpop.xlane.xlu1 %583 }
 0x333   : > { %v585_v63 = vsub.f32 %v581_v52, %v584_v62 }
 0x335   : > { %v586_v0 = vmul.f32 1.442695, %v585_v63 }
 0x337   : > { %v653_v61 = vpop.f32.mrf.mxu2  ;;  %1008 = vpow2.f32 %v586_v0 }
 0x338   : > { %v1001_v61 = vld [vmem:[%s1233_s8] ss:$0 sm:$0xff] }
 0x33d   : > { %v1009_v10 = vpop.eup %1008 }
 0x33e   : > { %v588_v13 = vsel %vm497_vm1, %v1009_v10, 0.0 }
 0x33f   : > { %v754_v1 = vpop.f32.mrf.mxu2 }
 0x340   : > { %v758_v2 = vmul.f32 0.35355338, %v754_v1 }
 0x342   : > { %v682_v3 = vpop.xlane.xlu0 %681  ;;  %v759_v5 = vadd.f32 %v758_v2, %v419_v29  ;;  %v1039_v2 = vmov 32.0  }
 0x343   : > { %v683_v6 = vsub.f32 %v679_v57, %v682_v3 }
 0x344   : > { %v760_v7 = vsel %vm497_vm1, %v759_v5, -inf }
 0x345   : > { %v684_v8 = vmul.f32 1.442695, %v683_v6  ;;  %761 = vmax.xlane.f32.xlu2 %v760_v7 }
 0x347   : > { %1010 = vpow2.f32 %v684_v8  ;;  %v756_v9 = vpop.f32.mrf.mxu2 }
 0x34a   : > { %v595_v11 = vpop.permute.xlu1 %594 }
 0x34b   : > { %v600_v12 = vsel %vm537_vm2, %v595_v11, 0 }
 0x34c   : > { %609 = vmatpush.bf16.msrb.mxu0 %v600_v12 }
 0x34d   : > { %v1011_v14 = vpop.eup %1010  ;;  %589 = vadd.xlane.f32.xlu2 %v588_v13 }
 0x34e   : > { %v686_v16 = vsel %vm497_vm1, %v1011_v14, 0.0 }
 0x34f   : > { %687 = vadd.xlane.f32.xlu0 %v686_v16 }
 0x363   : > { %692 = vrot.lane.b32.xlu0 %v1142_v15, %s1037_s12 }
 0x3b8   : > { %v762_v17 = vpop.xlane.xlu2 %761 }
 0x3b9   : > { %v763_v18 = vsub.f32 %v759_v5, %v762_v17 }
 0x3bb   : > { %v764_v19 = vmul.f32 1.442695, %v763_v18 }
 0x3bd   : > { %1012 = vpow2.f32 %v764_v19 }
 0x3c0   : > { %v590_v20 = vpop.xlane.xlu2 %589 }
 0x3c1   : > { %1014 = vrcp.f32 %v590_v20 }
 0x3c2   : > { %v688_v25 = vpop.xlane.xlu0 %687 }
 0x3c3   : > { %v1013_v21 = vpop.eup %1012  ;;  %1016 = vrcp.f32 %v688_v25  ;;  %v1003_v25 = vld [vmem:[%s1235_s10] ss:$0 sm:$0xff] }
 0x3c4   : > { %v766_v22 = vsel %vm497_vm1, %v1013_v21, 0.0 }
 0x3c5   : > { %767 = vadd.xlane.f32.xlu2 %v766_v22 }
 0x3c7   : > { %v1015_v23 = vpop.eup %1014 }
 0x3c8   : > { %v592_v24 = vmul.f32 %v1015_v23, %v1009_v10  ;;  %v1002_v23 = vld [vmem:[%s1234_s9] ss:$0 sm:$0xff] }
 0x3c9   : > { %v1017_v27 = vpop.eup %1016 }
 0x3ca   : > { %v593_v26 = vpack.c.bf16 %v592_v24, %v592_v24  ;;  %v690_v29 = vmul.f32 %v1017_v27, %v1011_v14 }
 0x3cc   : > { %968 = vmatmul.msk.bf16.vlgmr.msrb.gmra.mxu0 %vm497_vm1, %v593_v26  ;;  %v691_v31 = vpack.c.bf16 %v690_v29, %v690_v29 }
 0x3d5   : > { %v693_v28 = vpop.permute.xlu0 %692 }
 0x3d6   : > { %v698_v30 = vsel %vm537_vm2, %v693_v28, 0 }
 0x3d7   : > { %707 = vmatpush.bf16.msra.mxu0 %v698_v30 }
 0x3db   : > { %808 = vmatpush.bf16.msrb.mxu0 %v799_v48 }
 0x3dc   : > { %972 = vmatmul.msk.bf16.vlgmr.msra.gmra.mxu0 %vm497_vm1, %v691_v31 }
 0x3dd   : > { %772 = vrot.lane.b32.xlu2 %v1142_v15, %s1038_s13 }
 0x438   : > { %v768_v35 = vpop.xlane.xlu2 %767 }
 0x439   : > { %1018 = vrcp.f32 %v768_v35 }
 0x43a   : > { %1020 = vrcp.f32 %v1039_v2 }
 0x43f   : > { %v1019_v37 = vpop.eup %1018 }
 0x440   : > { %v770_v38 = vmul.f32 %v1019_v37, %v1013_v21  ;;  %v773_v39 = vpop.permute.xlu2 %772  ;;  %v1021_v3 = vpop.eup %1020 }
 0x441   : > { %v778_v15 = vsel %vm537_vm2, %v773_v39, 0  ;;  %vm831_vm3 = vweird.f32 %v1021_v3 }
 0x442   : > { %v771_v40 = vpack.c.bf16 %v770_v38, %v770_v38  ;;  %787 = vmatpush.bf16.msrb.mxu3 %v778_v15 }
 0x445   : > { %975 = vmatmul.msk.bf16.vlgmr.msrb.gmra.mxu3 %vm497_vm1, %v771_v40 }
 0x449   : > { %v611_v41 = vpop.f32.mrf.mxu0 }
 0x44a   : > { %v615_v42 = vpack.c.bf16 %v611_v41, %v611_v41 }
 0x44c   : > { %969 = vmatmul.msk.bf16.vlgmr.msrb.gmra.mxu1 %vm497_vm1, %v615_v42 }
 0x451   : > { %v613_v43 = vpop.f32.mrf.mxu0 }
 0x459   : > { %v709_v44 = vpop.f32.mrf.mxu0 }
 0x45a   : > { %v713_v45 = vpack.c.bf16 %v709_v44, %v709_v44 }
 0x45c   : > { %973 = vmatmul.msk.bf16.vlgmr.msra.gmra.mxu1 %vm497_vm1, %v713_v45 }
 0x461   : > { %v711_v46 = vpop.f32.mrf.mxu0 }
 0x4c8   : > { %v789_v49 = vpop.f32.mrf.mxu3 }
 0x4c9   : > { %v793_v50 = vpack.c.bf16 %v789_v49, %v789_v49  ;;  %v632_v51 = vpop.f32.mrf.mxu1 }
 0x4ca   : > { %v652_v54 = vadd.f32 %v1175_v60, %v632_v51  ;;  %v827_v60 = vmul.f32 32.0, %v1021_v3 }
 0x4cb   : > { %976 = vmatmul.msk.bf16.vlgmr.msrb.gmra.mxu0 %vm497_vm1, %v793_v50 }
 0x4cc   : > { %v828_v5 = vsub.f32 1.0, %v827_v60 }
 0x4ce   : > { %v829_v6 = vmul.f32 %v1021_v3, %v828_v5 }
 0x4d0   : > { %v791_v52 = vpop.f32.mrf.mxu3  ;;  %v830_v7 = vadd.f32 %v1021_v3, %v829_v6 }
 0x4d1   : > { %v634_v53 = vpop.f32.mrf.mxu1 }
 0x4d2   : > { %v832_v8 = vsel %vm831_vm3, %v1021_v3, %v830_v7 }
 0x4d9   : > { %v730_v55 = vpop.f32.mrf.mxu1 }
 0x4da   : > { %v734_v56 = vadd.f32 %v730_v55, %v652_v54 }
 0x4e1   : > { %v732_v57 = vpop.f32.mrf.mxu1 }
 0x548   : > { %v810_v58 = vpop.f32.mrf.mxu0 }
 0x549   : > { %v814_v59 = vadd.f32 %v810_v58, %v734_v56 }
 0x54b   : > { %v815_v62 = vadd.f32 %v814_v59, %v1126_v4 }
 0x54d   : > { %v820_v63 = vadd.f32 %v1001_v61, %v815_v62 }
 0x54f   : > { %v823_v0 = vsel %vm442_vm0, %v820_v63, 0.0 }
 0x550   : > { %824 = vadd.xlane.f32.xlu1 %v823_v0  ;;  %v812_v1 = vpop.f32.mrf.mxu0 }
 0x5c3   : > { %v825_v9 = vpop.xlane.xlu1 %824 }
 0x5c4   : > { %v833_v10 = vmul.f32 %v832_v8, %v825_v9 }
 0x5c6   : > { %v834_v11 = vsub.f32 %v820_v63, %v833_v10 }
 0x5c8   : > { %v835_v12 = vmul.f32 %v834_v11, %v834_v11 }
 0x5ca   : > { %v836_v4 = vsel %vm442_vm0, %v835_v12, 0.0 }
 0x5cb   : > { %837 = vadd.xlane.f32.xlu2 %v836_v4 }
 0x63e   : > { %v838_v13 = vpop.xlane.xlu2 %837 }
 0x63f   : > { %v839_v14 = vmul.f32 %v838_v13, %v832_v8 }
 0x641   : > { %v840_v16 = vadd.f32 1e-05, %v839_v14 }
 0x643   : > { %1022 = vrsqrt.f32 %v840_v16  ;;  %vm847_vm5 = vweird.f32 %v840_v16 }
 0x649   : > { %v1023_v17 = vpop.eup %1022 }
 0x64a   : > { %v842_v18 = vmul.f32 %v1023_v17, %v840_v16  ;;  %vm848_vm4 = vweird.f32 %v1023_v17 }
 0x64b   : > { %vm849_vm6 = vmor %vm847_vm5, %vm848_vm4 }
 0x64c   : > { %v843_v19 = vmul.f32 %v1023_v17, %v842_v18 }
 0x64e   : > { %v844_v20 = vmul.f32 0.5, %v843_v19 }
 0x650   : > { %v845_v21 = vsub.f32 1.5, %v844_v20 }
 0x652   : > { %v846_v22 = vmul.f32 %v1023_v17, %v845_v21 }
 0x654   : > { %v850_v24 = vsel %vm849_vm6, %v1023_v17, %v846_v22 }
 0x655   : > { %v851_v26 = vmul.f32 %v850_v24, %v834_v11 }
 0x657   : > { %v855_v27 = vmul.f32 %v1002_v23, %v851_v26 }
 0x659   : > { %v859_v28 = vadd.f32 %v1003_v25, %v855_v27 }
 0x65b   : > { %860 = vst.msk [vmem:[%s415_s30] sm:$0xff] %vm442_vm0, %v859_v28 }
 0x65c PF: > { %s21_s17 = sadd.s32 1, %s1030_s17  }
 0x65d   : > { %p18_p4 = scmp.ge.s32.totalorder %s21_s17, 4  }
 0x65f   :  { %20 = sbr.rel (!%p18_p4) target bundleno = 1 (0x1), region = 100 }

// kernel: run.11
= control target key start
LH: loop header
LB: loop body
LE: loop exit
PB: predicated region body
PF: predicated region fallthrough
CT: control target
= control target key end

     0   :  { %vm50_vm0 = vcmask 261120   ;;  %v286_v30 = vmov 32.0   ;;  %s388_s1 = inlined_call_operand.vmem [shape: bf16[32,128], index: 1, kind: input, shape index: {}]   ;;  %s389_s0 = inlined_call_operand.vmem [shape: f32[16,32], index: 0, kind: input, shape index: {}]   ;;  %s390_s3 = inlined_call_operand.vmem [shape: bf16[128,32], index: 3, kind: input, shape index: {}]   ;;  %s391_s2 = inlined_call_operand.vmem [shape: f32[1,128], index: 2, kind: input, shape index: {}]   ;;  %s392_s4 = inlined_call_operand.vmem [shape: f32[1,32], index: 4, kind: input, shape index: {}]   ;;  %s393_s5 = inlined_call_operand.vmem [shape: f32[1,32], index: 5, kind: input, shape index: {}]   ;;  %s394_s6 = inlined_call_operand.vmem [shape: f32[1,32], index: 6, kind: input, shape index: {}]   ;;  %s395_s7 = inlined_call_operand.vmem [shape: f32[16,32], index: 7, kind: output, shape index: {}]  }
   0x1   :  { %v266_v0 = vld [vmem:[%s388_s1 + $0x8] sm:$0xff]  ;;  %v265_v1 = vld [vmem:[%s388_s1] sm:$0xff]  ;;  %v274_v2 = vld [vmem:[%s390_s3 + $0x38] sm:$0xff]  ;;  %280 = vrcp.f32 %v286_v30 }
   0x2   :  { %60 = vmatpush.bf16.msra.mxu0 %v266_v0  ;;  %v27_v3 = vld [vmem:[%s389_s0] sm:$0xff]  ;;  %v28_v4 = vld [vmem:[%s389_s0 + $0x8] sm:$0xff]  ;;  %139 = vmatpush.bf16.msra.mxu1 %v274_v2  ;;  %v273_v5 = vld [vmem:[%s390_s3 + $0x30] sm:$0xff] }
   0x3   :  { %v29_v6 = vpack.c.bf16 %v28_v4, %v27_v3  ;;  %v272_v7 = vld [vmem:[%s390_s3 + $0x28] sm:$0xff]  ;;  %v271_v8 = vld [vmem:[%s390_s3 + $0x20] sm:$0xff]  ;;  %v270_v9 = vld [vmem:[%s390_s3 + $0x18] sm:$0xff] }
   0x4   :  { %v269_v10 = vld [vmem:[%s390_s3 + $0x10] sm:$0xff]  ;;  %v268_v11 = vld [vmem:[%s390_s3 + $0x8] sm:$0xff]  ;;  %v267_v12 = vld [vmem:[%s390_s3] sm:$0xff] }
   0x5   :  { %v276_v14 = vld [vmem:[%s391_s2] ss:$0 sm:$0xff] }
   0x6   :  { %61 = vmatpush.bf16.msra.mxu0 %v265_v1  ;;  %140 = vmatpush.bf16.msra.mxu1 %v273_v5  ;;  %v277_v21 = vld [vmem:[%s392_s4] ss:$0 sm:$0xff] }
   0x7   :  { %v281_v31 = vpop.eup %280  ;;  %v278_v61 = vld [vmem:[%s393_s5] ss:$0 sm:$0xff] }
   0x8   :  { %v164_v32 = vmul.f32 32.0, %v281_v31  ;;  %vm168_vm1 = vweird.f32 %v281_v31  ;;  %v279_v0 = vld [vmem:[%s394_s6] ss:$0 sm:$0xff] }
   0x9   :  { %232 = vmatmul.msk.bf16.vlgmr.msra.gmra.mxu0 %vm50_vm0, %v29_v6 }
   0xa   :  { %141 = vmatpush.bf16.msra.mxu1 %v272_v7  ;;  %v165_v33 = vsub.f32 1.0, %v164_v32 }
   0xc   :  { %v166_v34 = vmul.f32 %v281_v31, %v165_v33 }
   0xe   :  { %142 = vmatpush.bf16.msra.mxu1 %v271_v8  ;;  %v167_v35 = vadd.f32 %v281_v31, %v166_v34 }
  0x10   :  { %v169_v36 = vsel %vm168_vm1, %v281_v31, %v167_v35 }
  0x12   :  { %143 = vmatpush.bf16.msra.mxu1 %v270_v9 }
  0x16   :  { %144 = vmatpush.bf16.msra.mxu1 %v269_v10 }
  0x1a   :  { %145 = vmatpush.bf16.msra.mxu1 %v268_v11 }
  0x1e   :  { %146 = vmatpush.bf16.msra.mxu1 %v267_v12 }
  0x86   :  { %v63_v13 = vpop.f32.mrf.mxu0 }
  0x87   :  { %v64_v15 = vadd.f32 %v276_v14, %v63_v13 }
  0x89   :  { %v68_v18 = vmax.f32 %v64_v15, 0.0 }
  0x8e   :  { %v65_v16 = vpop.f32.mrf.mxu0 }
  0x8f   :  { %v66_v17 = vadd.f32 %v276_v14, %v65_v16 }
  0x91   :  { %v69_v19 = vmax.f32 %v66_v17, 0.0 }
  0x93   :  { %v70_v20 = vpack.c.bf16 %v69_v19, %v68_v18 }
  0x95   :  { %147 = vmatmul.bf16.vlgmr.msra.gmra.mxu1 %v70_v20 }
 0x112   :  { %v148_v22 = vpop.f32.mrf.mxu1 }
 0x113   :  { %v149_v23 = vadd.f32 %v277_v21, %v148_v22 }
 0x115   :  { %v153_v24 = vadd.f32 %v149_v23, %v27_v3 }
 0x117   :  { %v157_v25 = vsel %vm50_vm0, %v153_v24, 0.0 }
 0x118   :  { %158 = vadd.xlane.f32.xlu0 %v157_v25 }
 0x11a   :  { %v150_v26 = vpop.f32.mrf.mxu1 }
 0x11b   :  { %v151_v27 = vadd.f32 %v277_v21, %v150_v26 }
 0x11d   :  { %v154_v28 = vadd.f32 %v151_v27, %v28_v4 }
 0x11f   :  { %v160_v29 = vsel %vm50_vm0, %v154_v28, 0.0 }
 0x120   :  { %161 = vadd.xlane.f32.xlu0 %v160_v29 }
 0x18b   :  { %v159_v37 = vpop.xlane.xlu0 %158 }
 0x18c   :  { %v170_v38 = vmul.f32 %v169_v36, %v159_v37 }
 0x18e   :  { %v172_v39 = vsub.f32 %v153_v24, %v170_v38 }
 0x190   :  { %v174_v40 = vmul.f32 %v172_v39, %v172_v39 }
 0x192   :  { %v176_v41 = vsel %vm50_vm0, %v174_v40, 0.0 }
 0x193   :  { %177 = vadd.xlane.f32.xlu1 %v176_v41  ;;  %v162_v42 = vpop.xlane.xlu0 %161 }
 0x194   :  { %v171_v43 = vmul.f32 %v169_v36, %v162_v42 }
 0x196   :  { %v173_v44 = vsub.f32 %v154_v28, %v171_v43 }
 0x198   :  { %v175_v45 = vmul.f32 %v173_v44, %v173_v44 }
 0x19a   :  { %v179_v46 = vsel %vm50_vm0, %v175_v45, 0.0 }
 0x19b   :  { %180 = vadd.xlane.f32.xlu1 %v179_v46 }
 0x206   :  { %v178_v47 = vpop.xlane.xlu1 %177 }
 0x207   :  { %v182_v48 = vmul.f32 %v178_v47, %v169_v36 }
 0x209   :  { %v184_v49 = vadd.f32 1e-05, %v182_v48 }
 0x20b   :  { %282 = vrsqrt.f32 %v184_v49  ;;  %vm192_vm3 = vweird.f32 %v184_v49 }
 0x20e   :  { %v181_v50 = vpop.xlane.xlu1 %180 }
 0x20f   :  { %v183_v51 = vmul.f32 %v181_v50, %v169_v36 }
 0x211   :  { %v283_v52 = vpop.eup %282  ;;  %v185_v53 = vadd.f32 1e-05, %v183_v51 }
 0x212   :  { %v187_v54 = vmul.f32 %v283_v52, %v184_v49  ;;  %vm193_vm2 = vweird.f32 %v283_v52 }
 0x213   :  { %284 = vrsqrt.f32 %v185_v53  ;;  %vm194_vm4 = vmor %vm192_vm3, %vm193_vm2  ;;  %vm202_vm6 = vweird.f32 %v185_v53 }
 0x214   :  { %v188_v55 = vmul.f32 %v283_v52, %v187_v54 }
 0x216   :  { %v189_v56 = vmul.f32 0.5, %v188_v55 }
 0x218   :  { %v190_v57 = vsub.f32 1.5, %v189_v56 }
 0x219   :  { %v285_v58 = vpop.eup %284 }
 0x21a   :  { %v191_v59 = vmul.f32 %v283_v52, %v190_v57  ;;  %v197_v60 = vmul.f32 %v285_v58, %v185_v53  ;;  %vm203_vm5 = vweird.f32 %v285_v58 }
 0x21b   :  { %vm204_vm7 = vmor %vm202_vm6, %vm203_vm5 }
 0x21c   :  { %v195_v62 = vsel %vm194_vm4, %v283_v52, %v191_v59  ;;  %v198_v63 = vmul.f32 %v285_v58, %v197_v60 }
 0x21d   :  { %v206_v1 = vmul.f32 %v195_v62, %v172_v39 }
 0x21e   :  { %v199_v2 = vmul.f32 0.5, %v198_v63 }
 0x21f   :  { %v211_v3 = vmul.f32 %v278_v61, %v206_v1 }
 0x220   :  { %v200_v4 = vsub.f32 1.5, %v199_v2 }
 0x221   :  { %v216_v5 = vadd.f32 %v279_v0, %v211_v3 }
 0x222   :  { %v201_v6 = vmul.f32 %v285_v58, %v200_v4 }
 0x223   :  { %218 = vst.msk [vmem:[%s395_s7] sm:$0xff] %vm50_vm0, %v216_v5 }
 0x224   :  { %v205_v7 = vsel %vm204_vm7, %v285_v58, %v201_v6 }
 0x225   :  { %v207_v8 = vmul.f32 %v205_v7, %v173_v44 }
 0x227   :  { %v212_v9 = vmul.f32 %v278_v61, %v207_v8 }
 0x229   :  { %v217_v10 = vadd.f32 %v279_v0, %v212_v9 }
 0x22b   :  { %219 = vst.msk [vmem:[%s395_s7 + $0x8] sm:$0xff] %vm50_vm0, %v217_v10 }

// kernel: run.10
= control target key start
LH: loop header
LB: loop body
LE: loop exit
PB: predicated region body
PF: predicated region fallthrough
CT: control target
= control target key end

     0   :  { %s1106_s17 = smov 0   ;;  %s1234_s0 = inlined_call_operand.vmem [shape: f32[2,8,32], index: 0, kind: input, shape index: {}]   ;;  %s1235_s1 = inlined_call_operand.vmem [shape: f32[2,10,32], index: 1, kind: input, shape index: {}]   ;;  %s1236_s2 = inlined_call_operand.vmem [shape: f32[2,1,10], index: 2, kind: input, shape index: {}]   ;;  %s1237_s3 = inlined_call_operand.vmem [shape: bf16[32,32], index: 3, kind: input, shape index: {}]   ;;  %s1238_s4 = inlined_call_operand.vmem [shape: f32[1,32], index: 4, kind: input, shape index: {}]   ;;  %s1239_s5 = inlined_call_operand.vmem [shape: bf16[32,64], index: 5, kind: input, shape index: {}]   ;;  %s1240_s6 = inlined_call_operand.vmem [shape: f32[1,64], index: 6, kind: input, shape index: {}]   ;;  %s1241_s7 = inlined_call_operand.vmem [shape: bf16[32,32], index: 7, kind: input, shape index: {}]   ;;  %s1242_s8 = inlined_call_operand.vmem [shape: f32[1,32], index: 8, kind: input, shape index: {}]   ;;  %s1243_s9 = inlined_call_operand.vmem [shape: f32[1,32], index: 9, kind: input, shape index: {}]   ;;  %s1244_s10 = inlined_call_operand.vmem [shape: f32[1,32], index: 10, kind: input, shape index: {}]   ;;  %s1245_s11 = inlined_call_operand.vmem [shape: f32[2,8,32], index: 11, kind: output, shape index: {}]  }
   0x1 LB: > { %s942_s18 = sadd.s32 4294967295, %s1036_s17   ;;  %p946_p0 = scmp.ge.s32.totalorder %s1036_s17, 1  ;;  %s1036_s17 = sphi %s1106_s17, %s21_s17  }
   0x2   : > { %p354_p1 = scmp.lt.s32.totalorder %s1036_s17, 3 }
   0x4   : > { %p355_p2 = pnand %p946_p0, %p354_p1 }
   0x5   : > { %p400_p3 = scmp.lt.s32.totalorder (!%p355_p2), %s942_s18, 1  ;;  %s1038_s20 = smov (!%p355_p2), 120  }
   0x6   : > { %358 = sbr.rel (%p355_p2) target bundleno = 1637 (0x665), region = 64  ;;  %s1039_s23 = smov (!%p355_p2), 96  }
   0x7   : > { %s1040_s24 = smov (!%p355_p2), 104   ;;  %s1041_s25 = smov (!%p355_p2), 112  }
   0x8   : > { %s1042_s13 = smov (!%p355_p2), 88   ;;  %s1043_s14 = smov (!%p355_p2), 80  }
   0xb   : > { %v985_v0 = vld [vmem:[%s1237_s3 + $0x8] sm:$0xff]  ;;  %v984_v2 = vld [vmem:[%s1237_s3] sm:$0xff]  ;;  %s1247_s18 = smov (!%p400_p3, %s942_s18), 1  ;;  %vm443_vm0 = vcmask 261120   ;;  %vm499_vm1 = vcmask 64512   ;;  %vm626_vm2 = vcmask 1043456  }
   0xc   : > { %v987_v1 = vld [vmem:[%s1239_s5 + $0x8] sm:$0xff]  ;;  %453 = vmatpush.bf16.msra.mxu0 %v985_v0  ;;  %v986_v3 = vld [vmem:[%s1239_s5] sm:$0xff]  ;;  %s947_s27 = sshll.u32 %s1247_s18, 3  ;;  %s983_s28 = sshll.u32 %s1247_s18, 4  ;;  %vm543_vm3 = vcmask 1044480   ;;  %vm524_vm4 = vcmask 80896  }
   0xd   : > { %489 = vmatpush.bf16.msra.mxu1 %v987_v1  ;;  %s403_s12 = scalar_lea.vmem %s1234_s0, %s947_s27  ;;  %s408_s15 = scalar_lea.vmem %s1235_s1, %s983_s28  ;;  %v1004_v9 = vld [vmem:[%s1238_s4] ss:$0 sm:$0xff] }
   0xe   : > { %v1135_v4 = vld [vmem:[%s403_s12] sm:$0xff]  ;;  %v419_v7 = vld [vmem:[%s408_s15 + $0x8] sm:$0x3]  ;;  %s411_s29 = scalar_lea.vmem %s1236_s2, %s1247_s18 }
   0xf   : > { %v421_v5 = vpack.c.bf16 %v1135_v4, %v1135_v4  ;;  %v418_v6 = vld [vmem:[%s408_s15] sm:$0xff]  ;;  %s1044_s15 = smov 72  }
  0x10   : > { %454 = vmatpush.bf16.msra.mxu0 %v984_v2  ;;  %v422_v8 = vpack.c.bf16 %v419_v7, %v418_v6  ;;  %v1005_v14 = vld [vmem:[%s1240_s6] ss:$0 sm:$0xff] }
  0x11   : > { %490 = vmatpush.bf16.msra.mxu1 %v986_v3  ;;  %v561_v21 = vld [vmem:[%s1241_s7] sm:$0xf] }
  0x12   : > { %v647_v22 = vsel %vm626_vm2, %v561_v21, 0  ;;  %v1006_v30 = vld [vmem:[%s411_s29] ss:$0 sm:$0xff] }
  0x13   : > { %959 = vmatmul.msk.bf16.vlgmr.msra.gmra.mxu0 %vm443_vm0, %v421_v5 }
  0x14   : > { %968 = vmatmul.msk.bf16.vlgmr.msra.gmra.mxu1 %vm443_vm0, %v422_v8 }
  0x90   : > { %v456_v10 = vpop.f32.mrf.mxu0 }
  0x91   : > { %v457_v11 = vadd.f32 %v1004_v9, %v456_v10  ;;  %v492_v12 = vpop.f32.mrf.mxu1 }
  0x92   : > { %v493_v17 = vadd.f32 %v1005_v14, %v492_v12 }
  0x93   : > { %v497_v13 = vpack.c.bf16 %v457_v11, %v457_v11 }
  0x95   : > { %563 = vrot.lane.b32.xlu2 %v497_v13, %s1038_s20 }
  0x98   : > { %v458_v15 = vpop.f32.mrf.mxu0 }
  0x99   : > { %v494_v16 = vpop.f32.mrf.mxu1 }
  0x9a   : > { %v495_v18 = vadd.f32 %v1005_v14, %v494_v16 }
  0x9c   : > { %v1150_v19 = vpack.c.bf16 %v495_v18, %v493_v17 }
  0x9e   : > { %538 = vrot.lane.b32.xlu1 %v1150_v19, %s1039_s23  ;;  %744 = vrot.lane.b32.xlu2 %v1150_v19, %s1040_s24  ;;  %v504_v20 = vsel %vm499_vm1, %v1150_v19, 0 }
  0x9f   : > { %513 = vmatpush.bf16.xpose.msra.mxu2 %v504_v20 }
  0xa6   : > { %565 = vrot.lane.b32.xlu1 %v1150_v19, %s1038_s20  ;;  %662 = vrot.lane.b32.xlu2 %v497_v13, %s1041_s25 }
  0xa7   : > { %969 = vmatmul.msk.bf16.vlgmr.msra.gmra.mxu2 %vm499_vm1, %v497_v13 }
  0xa8   : > { %656 = vmatpush.bf16.msrb.mxu2 %v647_v22 }
  0xae   : > { %742 = vrot.lane.b32.xlu1 %v497_v13, %s1040_s24 }
  0xef   : > { %v564_v23 = vpop.permute.xlu2 %563 }
  0xf8   : > { %v745_v24 = vpop.permute.xlu2 %744 }
  0xf9   : > { %v750_v25 = vsel %vm499_vm1, %v745_v24, 0 }
  0xfa   : > { %759 = vmatpush.bf16.xpose.msra.mxu2 %v750_v25 }
 0x100   : > { %v663_v47 = vpop.permute.xlu2 %662 }
 0x110   : > { %v539_v26 = vpop.permute.xlu1 %538 }
 0x111   : > { %v545_v27 = vsel %vm543_vm3, %v539_v26, 0 }
 0x112   : > { %554 = vmatpush.bf16.msra.mxu3 %v545_v27 }
 0x118   : > { %v566_v28 = vpop.permute.xlu1 %565 }
 0x119   : > { %v571_v29 = vsel %vm499_vm1, %v566_v28, 0 }
 0x11a   : > { %580 = vmatpush.bf16.xpose.msrb.mxu3 %v571_v29 }
 0x120   : > { %v743_v53 = vpop.permute.xlu1 %742 }
 0x12a   : > { %v515_v31 = vpop.f32.mrf.mxu2 }
 0x12b   : > { %v519_v32 = vmul.f32 0.35355338, %v515_v31 }
 0x12d   : > { %v523_v33 = vadd.f32 %v1006_v30, %v519_v32 }
 0x12f   : > { %v525_v34 = vsel %vm524_vm4, %v523_v33, -inf }
 0x130   : > { %526 = vmax.xlane.f32.xlu0 %v525_v34  ;;  %v622_v34 = vld [vmem:[%s1241_s7 + $0x4] sm:$0xf] }
 0x132   : > { %v517_v35 = vpop.f32.mrf.mxu2 }
 0x133   : > { %v628_v35 = vsel %vm626_vm2, %v622_v34, 0 }
 0x134   : > { %637 = vmatpush.bf16.msrb.mxu1 %v628_v35 }
 0x1a3   : > { %v527_v36 = vpop.xlane.xlu0 %526 }
 0x1a4   : > { %v528_v37 = vsub.f32 %v523_v33, %v527_v36  ;;  %v721_v36 = vld [vmem:[%s1241_s7 + $0x8] sm:$0xf] }
 0x1a6   : > { %v529_v38 = vmul.f32 1.442695, %v528_v37 }
 0x1a8   : > { %1010 = vpow2.f32 %v529_v38  ;;  %v726_v38 = vsel %vm626_vm2, %v721_v36, 0 }
 0x1a9   : > { %735 = vmatpush.bf16.msra.mxu1 %v726_v38 }
 0x1ae   : > { %v1011_v39 = vpop.eup %1010 }
 0x1af   : > { %v531_v40 = vsel %vm524_vm4, %v1011_v39, 0.0 }
 0x1b0   : > { %532 = vadd.xlane.f32.xlu0 %v531_v40 }
 0x1c4   : > { %664 = vrot.lane.b32.xlu0 %v1150_v19, %s1041_s25 }
 0x223   : > { %v533_v41 = vpop.xlane.xlu0 %532 }
 0x224   : > { %1012 = vrcp.f32 %v533_v41 }
 0x22a   : > { %v1013_v42 = vpop.eup %1012 }
 0x22b   : > { %v535_v43 = vmul.f32 %v1013_v42, %v1011_v39 }
 0x22d   : > { %v536_v44 = vpack.c.bf16 %v535_v43, %v535_v43 }
 0x22f   : > { %970 = vmatmul.msk.bf16.vlgmr.msra.gmra.mxu3 %vm524_vm4, %v536_v44 }
 0x236   : > { %v665_v45 = vpop.permute.xlu0 %664 }
 0x237   : > { %v670_v46 = vsel %vm499_vm1, %v665_v45, 0 }
 0x238   : > { %679 = vmatpush.bf16.xpose.msra.mxu3 %v670_v46 }
 0x23f   : > { %971 = vmatmul.msk.bf16.vlgmr.msrb.gmra.mxu3 %vm499_vm1, %v564_v23 }
 0x24f   : > { %975 = vmatmul.msk.bf16.vlgmr.msra.gmra.mxu3 %vm499_vm1, %v663_v47 }
 0x2b2   : > { %v556_v48 = vpop.f32.mrf.mxu3 }
 0x2b3   : > { %v560_v49 = vpack.c.bf16 %v556_v48, %v556_v48 }
 0x2b5   : > { %974 = vmatmul.msk.bf16.vlgmr.msrb.gmra.mxu2 %vm499_vm1, %v560_v49  ;;  %v801_v49 = vld [vmem:[%s1241_s7 + $0xc] sm:$0xf] }
 0x2ba   : > { %v558_v50 = vpop.f32.mrf.mxu3 }
 0x2bb   : > { %v806_v50 = vsel %vm626_vm2, %v801_v49, 0 }
 0x2c2   : > { %v582_v51 = vpop.f32.mrf.mxu3 }
 0x2c3   : > { %v586_v52 = vmul.f32 0.35355338, %v582_v51 }
 0x2c5   : > { %978 = vmatmul.msk.bf16.vlgmr.msra.gmra.mxu2 %vm499_vm1, %v743_v53  ;;  %v587_v54 = vadd.f32 %v1006_v30, %v586_v52 }
 0x2c7   : > { %v588_v55 = vsel %vm524_vm4, %v587_v54, -inf }
 0x2c8   : > { %589 = vmax.xlane.f32.xlu1 %v588_v55 }
 0x2ca   : > { %v584_v56 = vpop.f32.mrf.mxu3 }
 0x2d2   : > { %v681_v57 = vpop.f32.mrf.mxu3 }
 0x2d3   : > { %v685_v58 = vmul.f32 0.35355338, %v681_v57 }
 0x2d5   : > { %v686_v59 = vadd.f32 %v1006_v30, %v685_v58 }
 0x2d7   : > { %v687_v60 = vsel %vm524_vm4, %v686_v59, -inf }
 0x2d8   : > { %688 = vmax.xlane.f32.xlu0 %v687_v60 }
 0x2da   : > { %v683_v61 = vpop.f32.mrf.mxu3 }
 0x2e1   : > { %600 = vrot.lane.b32.xlu1 %v1150_v19, %s1042_s13 }
 0x338   : > { %v1183_v62 = vpop.f32.mrf.mxu2 }
 0x33b   : > { %v590_v0 = vpop.xlane.xlu1 %589 }
 0x33c   : > { %v591_v1 = vsub.f32 %v587_v54, %v590_v0 }
 0x33e   : > { %v592_v2 = vmul.f32 1.442695, %v591_v1 }
 0x340   : > { %v660_v63 = vpop.f32.mrf.mxu2  ;;  %1014 = vpow2.f32 %v592_v2 }
 0x341   : > { %v1007_v63 = vld [vmem:[%s1242_s8] ss:$0 sm:$0xff] }
 0x346   : > { %v1015_v12 = vpop.eup %1014 }
 0x347   : > { %v594_v15 = vsel %vm524_vm4, %v1015_v12, 0.0 }
 0x348   : > { %v761_v3 = vpop.f32.mrf.mxu2 }
 0x349   : > { %v765_v5 = vmul.f32 0.35355338, %v761_v3 }
 0x34b   : > { %v689_v6 = vpop.xlane.xlu0 %688  ;;  %v766_v7 = vadd.f32 %v1006_v30, %v765_v5  ;;  %v1045_v5 = vmov 32.0  }
 0x34c   : > { %v690_v8 = vsub.f32 %v686_v59, %v689_v6 }
 0x34d   : > { %v767_v9 = vsel %vm524_vm4, %v766_v7, -inf }
 0x34e   : > { %v691_v10 = vmul.f32 1.442695, %v690_v8  ;;  %768 = vmax.xlane.f32.xlu2 %v767_v9 }
 0x350   : > { %1016 = vpow2.f32 %v691_v10  ;;  %v763_v11 = vpop.f32.mrf.mxu2 }
 0x353   : > { %v601_v13 = vpop.permute.xlu1 %600 }
 0x354   : > { %v606_v14 = vsel %vm543_vm3, %v601_v13, 0 }
 0x355   : > { %615 = vmatpush.bf16.msrb.mxu0 %v606_v14 }
 0x356   : > { %v1017_v16 = vpop.eup %1016  ;;  %595 = vadd.xlane.f32.xlu2 %v594_v15 }
 0x357   : > { %v693_v17 = vsel %vm524_vm4, %v1017_v16, 0.0 }
 0x358   : > { %694 = vadd.xlane.f32.xlu0 %v693_v17 }
 0x36c   : > { %699 = vrot.lane.b32.xlu0 %v1150_v19, %s1043_s14  ;;  %s415_s14 = scalar_lea.vmem %s1245_s11, %s947_s27 }
 0x3c1   : > { %v769_v18 = vpop.xlane.xlu2 %768 }
 0x3c2   : > { %v770_v20 = vsub.f32 %v766_v7, %v769_v18 }
 0x3c4   : > { %v771_v21 = vmul.f32 1.442695, %v770_v20 }
 0x3c6   : > { %1018 = vpow2.f32 %v771_v21 }
 0x3c9   : > { %v596_v22 = vpop.xlane.xlu2 %595 }
 0x3ca   : > { %1020 = vrcp.f32 %v596_v22 }
 0x3cb   : > { %v695_v27 = vpop.xlane.xlu0 %694 }
 0x3cc   : > { %v1019_v23 = vpop.eup %1018  ;;  %1022 = vrcp.f32 %v695_v27  ;;  %v1009_v27 = vld [vmem:[%s1244_s10] ss:$0 sm:$0xff] }
 0x3cd   : > { %v773_v24 = vsel %vm524_vm4, %v1019_v23, 0.0 }
 0x3ce   : > { %774 = vadd.xlane.f32.xlu2 %v773_v24 }
 0x3d0   : > { %v1021_v25 = vpop.eup %1020 }
 0x3d1   : > { %v598_v26 = vmul.f32 %v1021_v25, %v1015_v12  ;;  %v1008_v25 = vld [vmem:[%s1243_s9] ss:$0 sm:$0xff] }
 0x3d2   : > { %v1023_v29 = vpop.eup %1022 }
 0x3d3   : > { %v599_v28 = vpack.c.bf16 %v598_v26, %v598_v26  ;;  %v697_v31 = vmul.f32 %v1023_v29, %v1017_v16 }
 0x3d5   : > { %972 = vmatmul.msk.bf16.vlgmr.msrb.gmra.mxu0 %vm524_vm4, %v599_v28  ;;  %v698_v33 = vpack.c.bf16 %v697_v31, %v697_v31 }
 0x3de   : > { %v700_v30 = vpop.permute.xlu0 %699 }
 0x3df   : > { %v705_v32 = vsel %vm543_vm3, %v700_v30, 0 }
 0x3e0   : > { %714 = vmatpush.bf16.msra.mxu0 %v705_v32 }
 0x3e4   : > { %815 = vmatpush.bf16.msrb.mxu0 %v806_v50 }
 0x3e5   : > { %976 = vmatmul.msk.bf16.vlgmr.msra.gmra.mxu0 %vm524_vm4, %v698_v33 }
 0x3e6   : > { %779 = vrot.lane.b32.xlu2 %v1150_v19, %s1044_s15 }
 0x441   : > { %v775_v37 = vpop.xlane.xlu2 %774 }
 0x442   : > { %1024 = vrcp.f32 %v775_v37 }
 0x443   : > { %1026 = vrcp.f32 %v1045_v5 }
 0x448   : > { %v1025_v39 = vpop.eup %1024 }
 0x449   : > { %v777_v40 = vmul.f32 %v1025_v39, %v1019_v23  ;;  %v780_v41 = vpop.permute.xlu2 %779  ;;  %v1027_v6 = vpop.eup %1026 }
 0x44a   : > { %v785_v19 = vsel %vm543_vm3, %v780_v41, 0  ;;  %vm838_vm5 = vweird.f32 %v1027_v6 }
 0x44b   : > { %v778_v42 = vpack.c.bf16 %v777_v40, %v777_v40  ;;  %794 = vmatpush.bf16.msrb.mxu3 %v785_v19 }
 0x44e   : > { %979 = vmatmul.msk.bf16.vlgmr.msrb.gmra.mxu3 %vm524_vm4, %v778_v42 }
 0x452   : > { %v617_v43 = vpop.f32.mrf.mxu0 }
 0x453   : > { %v621_v44 = vpack.c.bf16 %v617_v43, %v617_v43 }
 0x455   : > { %973 = vmatmul.msk.bf16.vlgmr.msrb.gmra.mxu1 %vm499_vm1, %v621_v44 }
 0x45a   : > { %v619_v45 = vpop.f32.mrf.mxu0 }
 0x462   : > { %v716_v46 = vpop.f32.mrf.mxu0 }
 0x463   : > { %v720_v47 = vpack.c.bf16 %v716_v46, %v716_v46 }
 0x465   : > { %977 = vmatmul.msk.bf16.vlgmr.msra.gmra.mxu1 %vm499_vm1, %v720_v47 }
 0x46a   : > { %v718_v48 = vpop.f32.mrf.mxu0 }
 0x4d1   : > { %v796_v51 = vpop.f32.mrf.mxu3 }
 0x4d2   : > { %v800_v52 = vpack.c.bf16 %v796_v51, %v796_v51  ;;  %v639_v53 = vpop.f32.mrf.mxu1 }
 0x4d3   : > { %v659_v56 = vadd.f32 %v1183_v62, %v639_v53  ;;  %v834_v62 = vmul.f32 32.0, %v1027_v6 }
 0x4d4   : > { %980 = vmatmul.msk.bf16.vlgmr.msrb.gmra.mxu0 %vm499_vm1, %v800_v52 }
 0x4d5   : > { %v835_v7 = vsub.f32 1.0, %v834_v62 }
 0x4d7   : > { %v836_v8 = vmul.f32 %v1027_v6, %v835_v7 }
 0x4d9   : > { %v798_v54 = vpop.f32.mrf.mxu3  ;;  %v837_v9 = vadd.f32 %v1027_v6, %v836_v8 }
 0x4da   : > { %v641_v55 = vpop.f32.mrf.mxu1 }
 0x4db   : > { %v839_v10 = vsel %vm838_vm5, %v1027_v6, %v837_v9 }
 0x4e2   : > { %v737_v57 = vpop.f32.mrf.mxu1 }
 0x4e3   : > { %v741_v58 = vadd.f32 %v737_v57, %v659_v56 }
 0x4ea   : > { %v739_v59 = vpop.f32.mrf.mxu1 }
 0x551   : > { %v817_v60 = vpop.f32.mrf.mxu0 }
 0x552   : > { %v821_v61 = vadd.f32 %v817_v60, %v741_v58 }
 0x554   : > { %v822_v0 = vadd.f32 %v821_v61, %v1135_v4 }
 0x556   : > { %v827_v1 = vadd.f32 %v1007_v63, %v822_v0 }
 0x558   : > { %v830_v2 = vsel %vm443_vm0, %v827_v1, 0.0 }
 0x559   : > { %831 = vadd.xlane.f32.xlu1 %v830_v2  ;;  %v819_v3 = vpop.f32.mrf.mxu0 }
 0x5cc   : > { %v832_v11 = vpop.xlane.xlu1 %831 }
 0x5cd   : > { %v840_v12 = vmul.f32 %v839_v10, %v832_v11 }
 0x5cf   : > { %v841_v13 = vsub.f32 %v827_v1, %v840_v12 }
 0x5d1   : > { %v842_v14 = vmul.f32 %v841_v13, %v841_v13 }
 0x5d3   : > { %v843_v4 = vsel %vm443_vm0, %v842_v14, 0.0 }
 0x5d4   : > { %844 = vadd.xlane.f32.xlu2 %v843_v4 }
 0x647   : > { %v845_v15 = vpop.xlane.xlu2 %844 }
 0x648   : > { %v846_v16 = vmul.f32 %v845_v15, %v839_v10 }
 0x64a   : > { %v847_v17 = vadd.f32 1e-05, %v846_v16 }
 0x64c   : > { %1028 = vrsqrt.f32 %v847_v17  ;;  %vm854_vm7 = vweird.f32 %v847_v17 }
 0x652   : > { %v1029_v18 = vpop.eup %1028 }
 0x653   : > { %v849_v20 = vmul.f32 %v1029_v18, %v847_v17  ;;  %vm855_vm6 = vweird.f32 %v1029_v18 }
 0x654   : > { %vm856_vm8 = vmor %vm854_vm7, %vm855_vm6 }
 0x655   : > { %v850_v21 = vmul.f32 %v1029_v18, %v849_v20 }
 0x657   : > { %v851_v22 = vmul.f32 0.5, %v850_v21 }
 0x659   : > { %v852_v23 = vsub.f32 1.5, %v851_v22 }
 0x65b   : > { %v853_v24 = vmul.f32 %v1029_v18, %v852_v23 }
 0x65d   : > { %v857_v26 = vsel %vm856_vm8, %v1029_v18, %v853_v24 }
 0x65e   : > { %v858_v28 = vmul.f32 %v857_v26, %v841_v13 }
 0x660   : > { %v862_v29 = vmul.f32 %v1008_v25, %v858_v28 }
 0x662   : > { %v866_v30 = vadd.f32 %v1009_v27, %v862_v29 }
 0x664   : > { %867 = vst.msk [vmem:[%s415_s14] sm:$0xff] %vm443_vm0, %v866_v30 }
 0x665 PF: > { %s21_s17 = sadd.s32 1, %s1036_s17  }
 0x666   : > { %p18_p4 = scmp.ge.s32.totalorder %s21_s17, 4  }
 0x668   :  { %20 = sbr.rel (!%p18_p4) target bundleno = 1 (0x1), region = 100 }

// kernel: run.15
= control target key start
LH: loop header
LB: loop body
LE: loop exit
PB: predicated region body
PF: predicated region fallthrough
CT: control target
= control target key end

     0   :  { %vm20_vm0 = vcmask 408576   ;;  %v140_v1 = vmov 0.0   ;;  %s188_s0 = inlined_call_operand.vmem [shape: f32[16,32], index: 0, kind: input, shape index: {}]   ;;  %s189_s1 = inlined_call_operand.vmem [shape: bf16[32,50], index: 1, kind: input, shape index: {}]   ;;  %s190_s2 = inlined_call_operand.vmem [shape: f32[1,50], index: 2, kind: input, shape index: {}]   ;;  %s191_s3 = inlined_call_operand.hbm [shape: f32[16,50], index: 3, kind: output, shape index: {}]  }
   0x1   :  { %v108_v0 = vld [vmem:[%s189_s1 + $0x8] sm:$0xff]  ;;  %21 = vst.msk [vmem:[#allocation2] sm:$0xff] %vm20_vm0, %v140_v1 }
   0x2   :  { %8 = vsyncpa [#allocation4], 0  ;;  %54 = vmatpush.bf16.msra.mxu0 %v108_v0  ;;  %v107_v2 = vld [vmem:[%s189_s1] sm:$0xff]  ;;  %v26_v4 = vld [vmem:[%s188_s0 + $0x8] sm:$0xff]  ;;  %22 = vst.msk [vmem:[#allocation2 + $0x8] sm:$0xff] %vm20_vm0, %v140_v1  ;;  %vm44_vm1 = vcmask 261120  }
   0x3   :  { %v25_v3 = vld [vmem:[%s188_s0] sm:$0xff]  ;;  %s141_s0 = smov [#allocation3]   ;;  %s86_s24 = sshll.u32 %s191_s3, 4  ;;  %s87_s24 = int_to_ptr.hbm [resolvable:$true] %s86_s24 }
   0x4   :  { %v27_v5 = vpack.c.bf16 %v26_v4, %v25_v3  ;;  %v113_v10 = vld [vmem:[%s190_s2] ss:$0 sm:$0xff]  ;;  %s84_s21 = sshll.u32 %s141_s0, 4  ;;  %s142_s2 = smov 128   ;;  %s85_s21 = int_to_ptr.vmem [resolvable:$true] %s84_s21 }
   0x5   :  { %s143_s25 = smov 8  }
   0x6   :  { %55 = vmatpush.bf16.msra.mxu0 %v107_v2 }
   0x8   :  { %v23_v6 = vld [vmem:[#allocation2] sm:$0xff] }
   0x9   :  { %106 = vmatmul.msk.bf16.vlgmr.msra.gmra.mxu0 %vm44_vm1, %v27_v5  ;;  %v24_v9 = vld [vmem:[#allocation2 + $0x8] sm:$0xff] }
  0x86   :  { %v57_v7 = vpop.f32.mrf.mxu0 }
  0x87   :  { %v62_v8 = vadd.f32 %v57_v7, %v23_v6 }
  0x89   :  { %65 = vst.msk [vmem:[#allocation2] sm:$0xff] %vm20_vm0, %v62_v8 }
  0x8e   :  { %v59_v11 = vpop.f32.mrf.mxu0 }
  0x8f   :  { %v63_v12 = vadd.f32 %v59_v11, %v24_v9 }
  0x90   :  { %v70_v13 = vld [vmem:[#allocation2] sm:$0xff] }
  0x91   :  { %66 = vst.msk [vmem:[#allocation2 + $0x8] sm:$0xff] %vm20_vm0, %v63_v12  ;;  %v76_v14 = vadd.f32 %v113_v10, %v70_v13 }
  0x93   :  { %78 = vst.msk [vmem:[#allocation3] sm:$0xff] %vm20_vm0, %v76_v14 }
  0x98   :  { %v71_v15 = vld [vmem:[#allocation2 + $0x8] sm:$0xff] }
  0x99   :  { %v77_v16 = vadd.f32 %v113_v10, %v71_v15 }
  0x9b   :  { %79 = vst.msk [vmem:[#allocation3 + $0x8] sm:$0xff] %vm20_vm0, %v77_v16 }
  0x9c   :  { %92 = dma.vmem_to_hbm [thread:$0]  %s85_s21, 256, %s87_s24, [#allocation4], %s142_s2, %s142_s2, %s143_s25  }
  0x9d   :  { %138 = dma.done.wait [#allocation4], 256  }
  0x9e   :  { %139 = vsyncadd [#allocation4], 4294967040 }
  0x9f   :  { %97 = vsyncpa [#allocation4], 1 }

</bundles_post_ra>
